<compile_context>
chip_gen: v7x
topology: tpu7x:2x2x1
jax: 0.10.0
libtpu: 0.0.40
codegen_flags: <defaults>
</compile_context>

<pallas_src>
from functools import partial

import numpy as np
import jax
import jax.numpy as jnp
from jax import lax
from jax.experimental import pallas as pl
from jax.experimental.pallas import tpu as pltpu


_VMEM_LIMIT = 32 * 1024 * 1024               # scoped-VMEM budget, safe on v5e/v6e/v7x
DEFAULT_MASK_VALUE = -0.7 * float(np.finfo(np.float32).max)


# ----------------------------- tiling helpers --------------------------------

def _pick_tile(dim, preferred, align):
    """Largest tile <= preferred that divides dim and is a multiple of align,
    else the full dim (always a legal BlockSpec; only hit for small/odd dims)."""
    if dim % preferred == 0:
        return preferred
    t = (min(preferred, dim) // align) * align
    while t >= align:
        if dim % t == 0:
            return t
        t -= align
    return dim


def _attn_block(seq_len, preferred):
    """Attention block: largest multiple of 8 dividing S that is <= preferred."""
    if seq_len % preferred == 0:
        return preferred
    t = (min(preferred, seq_len) // 8) * 8
    while t >= 8:
        if seq_len % t == 0:
            return t
        t -= 8
    return seq_len


# ------------------------- tiled projection matmul ----------------------------

def _mm_kernel(x_ref, w_ref, o_ref, acc_ref):
    @pl.when(pl.program_id(2) == 0)
    def _():
        acc_ref[...] = jnp.zeros_like(acc_ref)

    acc_ref[...] += jnp.dot(x_ref[...], w_ref[...],
                            preferred_element_type=jnp.float32)

    @pl.when(pl.program_id(2) == pl.num_programs(2) - 1)
    def _():
        o_ref[...] = acc_ref[...].astype(o_ref.dtype)


def linear_tiled(x2d, w_t, *, out_dtype, tm=256, tn=256, tk=512):
    """x2d: (M, K) bf16, w_t: (K, N) bf16 -> (M, N) out_dtype.  bf16 MXU operands,
    f32 VMEM accumulator, K innermost / 'arbitrary'."""
    M, K = x2d.shape
    K2, N = w_t.shape
    assert K == K2
    tm = _pick_tile(M, tm, 8)
    tn = _pick_tile(N, tn, 128)
    tk = _pick_tile(K, tk, 128)
    grid = (M // tm, N // tn, K // tk)
    return pl.pallas_call(
        _mm_kernel,
        out_shape=jax.ShapeDtypeStruct((M, N), out_dtype),
        grid_spec=pltpu.PrefetchScalarGridSpec(
            num_scalar_prefetch=0,
            grid=grid,
            in_specs=[
                pl.BlockSpec((tm, tk), lambda i, j, k: (i, k)),
                pl.BlockSpec((tk, tn), lambda i, j, k: (k, j)),
            ],
            out_specs=pl.BlockSpec((tm, tn), lambda i, j, k: (i, j)),
            scratch_shapes=[pltpu.VMEM((tm, tn), jnp.float32)]),
        compiler_params=pltpu.CompilerParams(
            dimension_semantics=("parallel", "parallel", "arbitrary"),
            vmem_limit_bytes=_VMEM_LIMIT),
    )(x2d, w_t)


# --------------------- RoPE(k) applied once, outside attention ----------------

def _rope_k_kernel(k_ref, cos_ref, sin_ref, o_ref, *, num_kv_heads, head_dim):
    hd = head_dim
    half = hd // 2
    cos = cos_ref[...]                       # (blk, hd) f32
    sin = sin_ref[...]                       # (blk, hd) f32, rotate_half sign folded in
    for h in range(num_kv_heads):            # static unroll; 128-aligned lane slices
        kh = k_ref[:, h * hd:(h + 1) * hd].astype(jnp.float32)
        kh = kh * cos + pltpu.roll(kh, shift=half, axis=1) * sin
        o_ref[:, h * hd:(h + 1) * hd] = kh.astype(o_ref.dtype)


def rope_k_from_qkv(qkv, cos_k, sin_k, *, batch, seq_len, blk,
                    num_q_heads, num_kv_heads, head_dim):
    hd = head_dim
    KVH = num_kv_heads
    G = num_q_heads // KVH
    Hk = KVH * hd
    nblk = seq_len // blk
    kernel = partial(_rope_k_kernel, num_kv_heads=KVH, head_dim=hd)
    return pl.pallas_call(
        kernel,
        out_shape=jax.ShapeDtypeStruct((batch * seq_len, Hk), jnp.bfloat16),
        grid_spec=pltpu.PrefetchScalarGridSpec(
            num_scalar_prefetch=0,
            grid=(batch, nblk),
            in_specs=[
                # k columns of the fused qkv output: column block G (width Hk) == offset Hq.
                pl.BlockSpec((blk, Hk), lambda b, si: (b * nblk + si, G)),
                pl.BlockSpec((blk, hd), lambda b, si: (si, 0)),
                pl.BlockSpec((blk, hd), lambda b, si: (si, 0)),
            ],
            out_specs=pl.BlockSpec((blk, Hk), lambda b, si: (b * nblk + si, 0))),
        compiler_params=pltpu.CompilerParams(
            dimension_semantics=("parallel", "parallel"),
            vmem_limit_bytes=_VMEM_LIMIT),
    )(qkv, cos_k, sin_k)


# ---------------------- fused RoPE(q) + flash GQA attention -------------------

def _flash_gqa_kernel(q_ref, k_ref, v_ref, cos_q_ref, sin_q_ref, o_ref,
                      qrot_sc, m_sc, l_sc, acc_sc, *, num_groups, head_dim):
    # q_ref: (blk_q, G*hd) bf16 (q columns of fused qkv), k_ref/v_ref: (blk_k, hd) bf16,
    # cos_q/sin_q: (blk_q, hd) f32 with rotate_half sign AND softmax scale folded in.
    q_i = pl.program_id(2)
    kv_i = pl.program_id(3)
    G = num_groups
    hd = head_dim
    half = hd // 2
    blk_q = q_ref.shape[0]
    blk_k = k_ref.shape[0]

    # Once per q block (kv_i == 0): reset online-softmax state and compute RoPE(q)
    # (scale pre-folded) into a bf16 (G*blk_q, hd) scratch, relayouted so the whole
    # GQA group runs as ONE MXU dot per kv step.
    @pl.when(kv_i == 0)
    def _init():
        m_sc[...] = jnp.full(m_sc.shape, DEFAULT_MASK_VALUE, dtype=m_sc.dtype)
        l_sc[...] = jnp.zeros(l_sc.shape, dtype=l_sc.dtype)
        acc_sc[...] = jnp.zeros(acc_sc.shape, dtype=acc_sc.dtype)
        cos_q = cos_q_ref[...]
        sin_q = sin_q_ref[...]
        for g in range(G):                   # static unroll; 128-aligned lane slices
            qg = q_ref[:, g * hd:(g + 1) * hd].astype(jnp.float32)
            qg = qg * cos_q + pltpu.roll(qg, shift=half, axis=1) * sin_q
            qrot_sc[g * blk_q:(g + 1) * blk_q, :] = qg.astype(jnp.bfloat16)

    def _update(masked):
        k_mxu = k_ref[...]                   # bf16, RoPE already applied outside
        v_mxu = v_ref[...]                   # bf16
        q_all = qrot_sc[...]                 # (G*blk_q, hd) bf16

        # QK^T for the whole GQA group: one dot, bf16 operands, f32 accumulation.
        s = lax.dot_general(q_all, k_mxu, (((1,), (1,)), ((), ())),
                            preferred_element_type=jnp.float32)   # (G*blk_q, blk_k)
        if masked:                           # causal mask only on the diagonal block
            row = lax.broadcasted_iota(jnp.int32, s.shape, 0) % blk_q
            col = lax.broadcasted_iota(jnp.int32, s.shape, 1)
            s = jnp.where(col <= row, s, DEFAULT_MASK_VALUE)

        # Online softmax update (f32 stats).
        m_prev = m_sc[...]
        m_new = jnp.maximum(m_prev, jnp.max(s, axis=-1, keepdims=True))
        alpha = jnp.exp(m_prev - m_new)
        p = jnp.exp(s - m_new)
        l_sc[...] = alpha * l_sc[...] + jnp.sum(p, axis=-1, keepdims=True)
        acc_sc[...] = alpha * acc_sc[...] + jnp.dot(
            p.astype(jnp.bfloat16), v_mxu, preferred_element_type=jnp.float32)
        m_sc[...] = m_new

    @pl.when(kv_i < q_i)                     # fully visible block: no mask work
    def _off_diag():
        _update(masked=False)

    @pl.when(kv_i == q_i)                    # diagonal block: mask, then finalize
    def _diag():
        _update(masked=True)
        out = acc_sc[...] * (1.0 / l_sc[...])        # exact divide, once per q block
        for g in range(G):                   # write lane-dense (blk_q, G*hd) output
            o_ref[:, g * hd:(g + 1) * hd] = (
                out[g * blk_q:(g + 1) * blk_q, :].astype(o_ref.dtype))
    # kv_i > q_i: dead step - k/v index maps are clamped to the diagonal, so the
    # resident block is reused (no DMA) and no compute runs.


def flash_gqa_attention(qkv, k_rot, cos_q, sin_q, *, batch, seq_len, blk,
                        num_q_heads, num_kv_heads, head_dim):
    hd = head_dim
    KVH = num_kv_heads
    G = num_q_heads // KVH
    Hq = num_q_heads * hd
    nblk = seq_len // blk
    grid = (batch, KVH, nblk, nblk)

    kernel = partial(_flash_gqa_kernel, num_groups=G, head_dim=hd)

    # Causal clamp: above-diagonal steps reuse the already-resident diagonal block.
    def _kv_row(b, qi, ki):
        return b * nblk + jnp.minimum(ki, qi)

    q_spec = pl.BlockSpec((blk, G * hd), lambda b, h, qi, ki: (b * nblk + qi, h))
    k_spec = pl.BlockSpec((blk, hd), lambda b, h, qi, ki: (_kv_row(b, qi, ki), h))
    v_spec = pl.BlockSpec((blk, hd),
                          lambda b, h, qi, ki: (_kv_row(b, qi, ki),
                                                num_q_heads + KVH + h))
    cos_spec = pl.BlockSpec((blk, hd), lambda b, h, qi, ki: (qi, 0))
    sin_spec = pl.BlockSpec((blk, hd), lambda b, h, qi, ki: (qi, 0))
    out_spec = pl.BlockSpec((blk, G * hd), lambda b, h, qi, ki: (b * nblk + qi, h))

    return pl.pallas_call(
        kernel,
        out_shape=jax.ShapeDtypeStruct((batch * seq_len, Hq), jnp.bfloat16),
        grid_spec=pltpu.PrefetchScalarGridSpec(
            num_scalar_prefetch=0,
            grid=grid,
            in_specs=[q_spec, k_spec, v_spec, cos_spec, sin_spec],
            out_specs=out_spec,
            scratch_shapes=[
                pltpu.VMEM((G * blk, hd), jnp.bfloat16),   # RoPE(q) (scale folded)
                pltpu.VMEM((G * blk, 1), jnp.float32),     # running max
                pltpu.VMEM((G * blk, 1), jnp.float32),     # running denom
                pltpu.VMEM((G * blk, hd), jnp.float32),    # output accumulator
            ]),
        compiler_params=pltpu.CompilerParams(
            dimension_semantics=("parallel", "parallel", "parallel", "arbitrary"),
            vmem_limit_bytes=_VMEM_LIMIT),
    )(qkv, k_rot, qkv, cos_q, sin_q)


# ------------------------------- full forward --------------------------------

def prepare_params(wq, wk, wv, wo, cos_t, sin_t, num_q_heads, num_kv_heads):
    """One-time prep (outside jit): fused + transposed + bf16 weights, and cos/sin
    tables with the rotate_half sign (and the softmax scale on the q side) folded in."""
    del num_kv_heads
    hidden = wq.shape[1]
    hd = hidden // num_q_heads
    scale = hd ** (-0.5)
    w_qkv_t = jnp.concatenate([wq, wk, wv], axis=0).T.astype(jnp.bfloat16)  # (hidden, Hq+2Hk)
    wo_t = wo.T.astype(jnp.bfloat16)                                        # (Hq, hidden)
    sign = jnp.concatenate([-jnp.ones((hd // 2,), jnp.float32),
                            jnp.ones((hd // 2,), jnp.float32)])
    cos_q = (cos_t * scale).astype(jnp.float32)
    sin_q = (sin_t * sign[None, :] * scale).astype(jnp.float32)
    cos_k = cos_t.astype(jnp.float32)
    sin_k = (sin_t * sign[None, :]).astype(jnp.float32)
    return w_qkv_t, wo_t, cos_q, sin_q, cos_k, sin_k


def rope_gqa_attention(x, w_qkv_t, wo_t, cos_q, sin_q, cos_k, sin_k,
                       num_q_heads, num_kv_heads, block=128):
    """Forward pass of RoPEMultiHeadAttentionWithGQA (bias=False, dropout=0, causal).
    `block` is the attention q/kv block; 128 suits v5e, 256 fills the v6e/v7x MXU."""
    B, S, hidden = x.shape
    hd = hidden // num_q_heads
    KVH = num_kv_heads
    assert S % 8 == 0, "pad S to a multiple of 8 for the (8,128) BlockSpec rule"

    blk = _attn_block(S, block)

    # Fused q/k/v projection: x streamed from HBM once, bf16 output halves the
    # attention kernel's q/k/v streaming traffic.
    x2d = x.reshape(B * S, hidden).astype(jnp.bfloat16)
    qkv = linear_tiled(x2d, w_qkv_t, out_dtype=jnp.bfloat16)    # (B*S, Hq + 2*Hk)

    # RoPE(k) once (k has only KVH heads); avoids recomputing it per q block.
    k_rot = rope_k_from_qkv(qkv, cos_k[:S], sin_k[:S], batch=B, seq_len=S, blk=blk,
                            num_q_heads=num_q_heads, num_kv_heads=KVH, head_dim=hd)

    # Flash GQA attention reads q/v straight from the fused qkv buffer and writes
    # (B*S, Hq) so the reshape before the o-projection is free.
    attn2d = flash_gqa_attention(qkv, k_rot, cos_q[:S], sin_q[:S],
                                 batch=B, seq_len=S, blk=blk,
                                 num_q_heads=num_q_heads, num_kv_heads=KVH,
                                 head_dim=hd)

    out2d = linear_tiled(attn2d, wo_t, out_dtype=x.dtype)       # (B*S, hidden)
    return out2d.reshape(B, S, hidden)


# ------------------------- plain-JAX reference -------------------------------

def _reference(x, wq, wk, wv, wo, cos_t, sin_t, num_q_heads, num_kv_heads):
    B, S, hidden = x.shape
    hd = hidden // num_q_heads
    G = num_q_heads // num_kv_heads
    scale = hd ** (-0.5)
    q = (x @ wq.T).reshape(B, S, num_q_heads, hd).transpose(0, 2, 1, 3)
    k = (x @ wk.T).reshape(B, S, num_kv_heads, hd).transpose(0, 2, 1, 3)
    v = (x @ wv.T).reshape(B, S, num_kv_heads, hd).transpose(0, 2, 1, 3)
    c, s = cos_t[:S], sin_t[:S]

    def rope(t):
        t2 = jnp.concatenate([-t[..., hd // 2:], t[..., :hd // 2]], axis=-1)
        return t * c + t2 * s

    q, k = rope(q), rope(k)
    k = jnp.repeat(k, G, axis=1)
    v = jnp.repeat(v, G, axis=1)
    scores = jnp.einsum("bhqd,bhkd->bhqk", q, k) * scale
    mask = jnp.tril(jnp.ones((S, S), dtype=bool))
    scores = jnp.where(mask, scores, -jnp.inf)
    attn = jax.nn.softmax(scores, axis=-1)
    o = jnp.einsum("bhqk,bhkd->bhqd", attn, v)
    o = o.transpose(0, 2, 1, 3).reshape(B, S, num_q_heads * hd)
    return o @ wo.T


# --------------------------------- main --------------------------------------

if __name__ == "__main__":
    # Small but layout-realistic shapes: head_dim = 128 keeps lanes dense.
    hidden_size = 512
    num_q_heads = 4
    num_kv_heads = 2
    head_dim = hidden_size // num_q_heads      # 128
    B, S, S_max = 2, 16, 32

    key = jax.random.PRNGKey(0)
    kx, kq, kk, kv_, ko = jax.random.split(key, 5)
    x = jax.random.normal(kx, (B, S, hidden_size), jnp.float32)

    # PyTorch nn.Linear weights are (out_features, in_features), bias=False.
    wq = jax.random.normal(kq, (num_q_heads * head_dim, hidden_size), jnp.float32) * 0.05
    wk = jax.random.normal(kk, (num_kv_heads * head_dim, hidden_size), jnp.float32) * 0.05
    wv = jax.random.normal(kv_, (num_kv_heads * head_dim, hidden_size), jnp.float32) * 0.05
    wo = jax.random.normal(ko, (hidden_size, num_q_heads * head_dim), jnp.float32) * 0.05

    # Standard RoPE tables over head_dim: (S_max, head_dim).
    pos = jnp.arange(S_max, dtype=jnp.float32)
    inv_freq = 1.0 / (10000.0 ** (jnp.arange(0, head_dim, 2, dtype=jnp.float32) / head_dim))
    freqs = pos[:, None] * inv_freq[None, :]
    emb = jnp.concatenate([freqs, freqs], axis=-1)
    cos_t, sin_t = jnp.cos(emb), jnp.sin(emb)

    # Weight/table prep happens once, OUTSIDE the jitted forward.
    params = prepare_params(wq, wk, wv, wo, cos_t, sin_t, num_q_heads, num_kv_heads)

    fwd = jax.jit(rope_gqa_attention, static_argnums=(7, 8))
    out = fwd(x, *params, num_q_heads, num_kv_heads)
    out = jax.block_until_ready(out)

    ref = _reference(x, wq, wk, wv, wo, cos_t, sin_t, num_q_heads, num_kv_heads)
    # Tolerance sized for bf16 operands/storage in the projections and attention dots
    # (all accumulation in f32); values are O(1).
    np.testing.assert_allclose(np.asarray(out), np.asarray(ref), atol=5e-2, rtol=5e-2)

    print("KERNEL_OK")
</pallas_src>

<mosaic_0001>
module attributes {stable_mosaic.version = 11 : i64} {
  func.func @_flash_gqa_kernel(%arg0: i32, %arg1: i32, %arg2: i32, %arg3: i32, %arg4: memref<16x256xbf16, #tpu.memory_space<vmem>>, %arg5: memref<16x128xbf16, #tpu.memory_space<vmem>>, %arg6: memref<16x128xbf16, #tpu.memory_space<vmem>>, %arg7: memref<16x128xf32, #tpu.memory_space<vmem>>, %arg8: memref<16x128xf32, #tpu.memory_space<vmem>>, %arg9: memref<16x256xbf16, #tpu.memory_space<vmem>>, %arg10: memref<32x128xbf16, #tpu.memory_space<vmem>>, %arg11: memref<32x1xf32, #tpu.memory_space<vmem>>, %arg12: memref<32x1xf32, #tpu.memory_space<vmem>>, %arg13: memref<32x128xf32, #tpu.memory_space<vmem>>) attributes {dimension_semantics = [#tpu.dimension_semantics<parallel>, #tpu.dimension_semantics<parallel>, #tpu.dimension_semantics<parallel>, #tpu.dimension_semantics<arbitrary>], iteration_bounds = array<i64: 2, 2, 1, 1>, scalar_prefetch = 0 : i64, scratch_operands = 4 : i64, tpu.core_type = #tpu.core_type<tc>, window_params = [{transform_indices = @transform_0, window_bounds = array<i64: 16, 256>}, {transform_indices = @transform_1, window_bounds = array<i64: 16, 128>}, {transform_indices = @transform_2, window_bounds = array<i64: 16, 128>}, {transform_indices = @transform_3, window_bounds = array<i64: 16, 128>}, {transform_indices = @transform_4, window_bounds = array<i64: 16, 128>}, {transform_indices = @transform_5, window_bounds = array<i64: 16, 256>}]} {
    %c0_i32 = arith.constant 0 : i32
    %0 = arith.cmpi eq, %arg3, %c0_i32 : i32
    %1 = arith.extui %0 : i1 to i32
    %c0_i32_0 = arith.constant 0 : i32
    %2 = arith.cmpi ne, %1, %c0_i32_0 : i32
    scf.if %2 {
      %cst = arith.constant -2.38197633E+38 : f32
      %9 = vector.broadcast %cst : f32 to vector<32x1xf32>
      %c0 = arith.constant 0 : index
      %c0_3 = arith.constant 0 : index
      %10 = vector.load %arg11[%c0, %c0_3] : memref<32x1xf32, #tpu.memory_space<vmem>>, vector<32x1xf32>
      tpu.vector_store %arg11[%c0, %c0_3], %9 {strides = array<i32>} : memref<32x1xf32, #tpu.memory_space<vmem>>, vector<32x1xf32>,
      %cst_4 = arith.constant 0.000000e+00 : f32
      %11 = vector.broadcast %cst_4 : f32 to vector<32x1xf32>
      %c0_5 = arith.constant 0 : index
      %c0_6 = arith.constant 0 : index
      %12 = vector.load %arg12[%c0_5, %c0_6] : memref<32x1xf32, #tpu.memory_space<vmem>>, vector<32x1xf32>
      tpu.vector_store %arg12[%c0_5, %c0_6], %11 {strides = array<i32>} : memref<32x1xf32, #tpu.memory_space<vmem>>, vector<32x1xf32>,
      %cst_7 = arith.constant 0.000000e+00 : f32
      %13 = vector.broadcast %cst_7 : f32 to vector<32x128xf32>
      %c0_8 = arith.constant 0 : index
      %c0_9 = arith.constant 0 : index
      %14 = vector.load %arg13[%c0_8, %c0_9] : memref<32x128xf32, #tpu.memory_space<vmem>>, vector<32x128xf32>
      tpu.vector_store %arg13[%c0_8, %c0_9], %13 {strides = array<i32>} : memref<32x128xf32, #tpu.memory_space<vmem>>, vector<32x128xf32>,
      %c0_10 = arith.constant 0 : index
      %c0_11 = arith.constant 0 : index
      %15 = vector.load %arg7[%c0_10, %c0_11] : memref<16x128xf32, #tpu.memory_space<vmem>>, vector<16x128xf32>
      %c0_12 = arith.constant 0 : index
      %c0_13 = arith.constant 0 : index
      %16 = vector.load %arg8[%c0_12, %c0_13] : memref<16x128xf32, #tpu.memory_space<vmem>>, vector<16x128xf32>
      %c0_14 = arith.constant 0 : index
      %c0_15 = arith.constant 0 : index
      %17 = vector.load %arg4[%c0_14, %c0_15] : memref<16x256xbf16, #tpu.memory_space<vmem>>, vector<16x128xbf16>
      %18 = arith.extf %17 : vector<16x128xbf16> to vector<16x128xf32>
      %19 = arith.mulf %18, %15 : vector<16x128xf32>
      %c64_i32 = arith.constant 64 : i32
      %20 = tpu.dynamic_rotate %18 by %c64_i32 dim 1 : vector<16x128xf32>, i32 -> vector<16x128xf32>
      %21 = arith.mulf %20, %16 : vector<16x128xf32>
      %22 = arith.addf %19, %21 : vector<16x128xf32>
      %23 = arith.truncf %22 : vector<16x128xf32> to vector<16x128xbf16>
      %c0_16 = arith.constant 0 : index
      %c0_17 = arith.constant 0 : index
      %24 = vector.load %arg10[%c0_16, %c0_17] : memref<32x128xbf16, #tpu.memory_space<vmem>>, vector<16x128xbf16>
      tpu.vector_store %arg10[%c0_16, %c0_17], %23 {strides = array<i32>} : memref<32x128xbf16, #tpu.memory_space<vmem>>, vector<16x128xbf16>,
      %c0_18 = arith.constant 0 : index
      %c128 = arith.constant 128 : index
      %25 = vector.load %arg4[%c0_18, %c128] : memref<16x256xbf16, #tpu.memory_space<vmem>>, vector<16x128xbf16>
      %26 = arith.extf %25 : vector<16x128xbf16> to vector<16x128xf32>
      %27 = arith.mulf %26, %15 : vector<16x128xf32>
      %c64_i32_19 = arith.constant 64 : i32
      %28 = tpu.dynamic_rotate %26 by %c64_i32_19 dim 1 : vector<16x128xf32>, i32 -> vector<16x128xf32>
      %29 = arith.mulf %28, %16 : vector<16x128xf32>
      %30 = arith.addf %27, %29 : vector<16x128xf32>
      %31 = arith.truncf %30 : vector<16x128xf32> to vector<16x128xbf16>
      %c16 = arith.constant 16 : index
      %c0_20 = arith.constant 0 : index
      %32 = vector.load %arg10[%c16, %c0_20] : memref<32x128xbf16, #tpu.memory_space<vmem>>, vector<16x128xbf16>
      tpu.vector_store %arg10[%c16, %c0_20], %31 {strides = array<i32>} : memref<32x128xbf16, #tpu.memory_space<vmem>>, vector<16x128xbf16>,
    } else {
    }
    %3 = arith.cmpi slt, %arg3, %arg2 : i32
    %4 = arith.extui %3 : i1 to i32
    %c0_i32_1 = arith.constant 0 : i32
    %5 = arith.cmpi ne, %4, %c0_i32_1 : i32
    scf.if %5 {
      %c0 = arith.constant 0 : index
      %c0_3 = arith.constant 0 : index
      %9 = vector.load %arg5[%c0, %c0_3] : memref<16x128xbf16, #tpu.memory_space<vmem>>, vector<16x128xbf16>
      %c0_4 = arith.constant 0 : index
      %c0_5 = arith.constant 0 : index
      %10 = vector.load %arg6[%c0_4, %c0_5] : memref<16x128xbf16, #tpu.memory_space<vmem>>, vector<16x128xbf16>
      %c0_6 = arith.constant 0 : index
      %c0_7 = arith.constant 0 : index
      %11 = vector.load %arg10[%c0_6, %c0_7] : memref<32x128xbf16, #tpu.memory_space<vmem>>, vector<32x128xbf16>
      %cst = arith.constant dense<0.000000e+00> : vector<32x16xf32>
      %12 = tpu.matmul %11, %9, %cst {dimension_numbers = #tpu.dot_dimension_numbers<[1], [1], [0], [0], [0, 0, 1, 0], [], []>} : vector<32x128xbf16>, vector<16x128xbf16>, vector<32x16xf32> -> vector<32x16xf32>
      %c0_8 = arith.constant 0 : index
      %c0_9 = arith.constant 0 : index
      %13 = vector.load %arg11[%c0_8, %c0_9] : memref<32x1xf32, #tpu.memory_space<vmem>>, vector<32x1xf32>
      %cst_10 = arith.constant dense<0xFF800000> : vector<32xf32>
      %14 = vector.multi_reduction <maximumf>, %12, %cst_10 [1] : vector<32x16xf32> to vector<32xf32>
      %15 = vector.shape_cast %14 : vector<32xf32> to vector<32x1xf32>
      %16 = arith.maximumf %13, %15 : vector<32x1xf32>
      %17 = arith.subf %13, %16 : vector<32x1xf32>
      %18 = math.exp %17 : vector<32x1xf32>
      %19 = vector.broadcast %16 : vector<32x1xf32> to vector<32x16xf32>
      %20 = arith.subf %12, %19 : vector<32x16xf32>
      %21 = math.exp %20 : vector<32x16xf32>
      %c0_11 = arith.constant 0 : index
      %c0_12 = arith.constant 0 : index
      %22 = vector.load %arg12[%c0_11, %c0_12] : memref<32x1xf32, #tpu.memory_space<vmem>>, vector<32x1xf32>
      %23 = arith.mulf %18, %22 : vector<32x1xf32>
      %cst_13 = arith.constant dense<0.000000e+00> : vector<32xf32>
      %24 = vector.multi_reduction <add>, %21, %cst_13 [1] : vector<32x16xf32> to vector<32xf32>
      %25 = vector.shape_cast %24 : vector<32xf32> to vector<32x1xf32>
      %26 = arith.addf %23, %25 : vector<32x1xf32>
      %c0_14 = arith.constant 0 : index
      %c0_15 = arith.constant 0 : index
      %27 = vector.load %arg12[%c0_14, %c0_15] : memref<32x1xf32, #tpu.memory_space<vmem>>, vector<32x1xf32>
      tpu.vector_store %arg12[%c0_14, %c0_15], %26 {strides = array<i32>} : memref<32x1xf32, #tpu.memory_space<vmem>>, vector<32x1xf32>,
      %c0_16 = arith.constant 0 : index
      %c0_17 = arith.constant 0 : index
      %28 = vector.load %arg13[%c0_16, %c0_17] : memref<32x128xf32, #tpu.memory_space<vmem>>, vector<32x128xf32>
      %29 = vector.broadcast %18 : vector<32x1xf32> to vector<32x128xf32>
      %30 = arith.mulf %29, %28 : vector<32x128xf32>
      %31 = arith.truncf %21 : vector<32x16xf32> to vector<32x16xbf16>
      %cst_18 = arith.constant dense<0.000000e+00> : vector<32x128xf32>
      %32 = tpu.matmul %31, %10, %cst_18 {dimension_numbers = #tpu.dot_dimension_numbers<[1], [0], [0], [1], [0, 0, 1, 1], [], []>} : vector<32x16xbf16>, vector<16x128xbf16>, vector<32x128xf32> -> vector<32x128xf32>
      %33 = arith.addf %30, %32 : vector<32x128xf32>
      %c0_19 = arith.constant 0 : index
      %c0_20 = arith.constant 0 : index
      %34 = vector.load %arg13[%c0_19, %c0_20] : memref<32x128xf32, #tpu.memory_space<vmem>>, vector<32x128xf32>
      tpu.vector_store %arg13[%c0_19, %c0_20], %33 {strides = array<i32>} : memref<32x128xf32, #tpu.memory_space<vmem>>, vector<32x128xf32>,
      %c0_21 = arith.constant 0 : index
      %c0_22 = arith.constant 0 : index
      %35 = vector.load %arg11[%c0_21, %c0_22] : memref<32x1xf32, #tpu.memory_space<vmem>>, vector<32x1xf32>
      tpu.vector_store %arg11[%c0_21, %c0_22], %16 {strides = array<i32>} : memref<32x1xf32, #tpu.memory_space<vmem>>, vector<32x1xf32>,
    } else {
    }
    %6 = arith.cmpi eq, %arg3, %arg2 : i32
    %7 = arith.extui %6 : i1 to i32
    %c0_i32_2 = arith.constant 0 : i32
    %8 = arith.cmpi ne, %7, %c0_i32_2 : i32
    scf.if %8 {
      %c0 = arith.constant 0 : index
      %c0_3 = arith.constant 0 : index
      %9 = vector.load %arg5[%c0, %c0_3] : memref<16x128xbf16, #tpu.memory_space<vmem>>, vector<16x128xbf16>
      %c0_4 = arith.constant 0 : index
      %c0_5 = arith.constant 0 : index
      %10 = vector.load %arg6[%c0_4, %c0_5] : memref<16x128xbf16, #tpu.memory_space<vmem>>, vector<16x128xbf16>
      %c0_6 = arith.constant 0 : index
      %c0_7 = arith.constant 0 : index
      %11 = vector.load %arg10[%c0_6, %c0_7] : memref<32x128xbf16, #tpu.memory_space<vmem>>, vector<32x128xbf16>
      %cst = arith.constant dense<0.000000e+00> : vector<32x16xf32>
      %12 = tpu.matmul %11, %9, %cst {dimension_numbers = #tpu.dot_dimension_numbers<[1], [1], [0], [0], [0, 0, 1, 0], [], []>} : vector<32x128xbf16>, vector<16x128xbf16>, vector<32x16xf32> -> vector<32x16xf32>
      %13 = tpu.iota {dimensions = array<i32: 0>} : vector<32x16xi32>
      %c16_i32 = arith.constant 16 : i32
      %c0_i32_8 = arith.constant 0 : i32
      %14 = arith.cmpi eq, %c16_i32, %c0_i32_8 : i32
      %c1_i32 = arith.constant 1 : i32
      %15 = arith.select %14, %c1_i32, %c16_i32 : i32
      %16 = vector.broadcast %15 : i32 to vector<32x16xi32>
      %17 = arith.remsi %13, %16 : vector<32x16xi32>
      %c0_i32_9 = arith.constant 0 : i32
      %18 = vector.broadcast %c0_i32_9 : i32 to vector<32x16xi32>
      %19 = arith.cmpi ne, %17, %18 : vector<32x16xi32>
      %c0_i32_10 = arith.constant 0 : i32
      %20 = vector.broadcast %c0_i32_10 : i32 to vector<32x16xi32>
      %21 = arith.cmpi slt, %17, %20 : vector<32x16xi32>
      %c0_i32_11 = arith.constant 0 : i32
      %22 = arith.cmpi slt, %15, %c0_i32_11 : i32
      %23 = vector.broadcast %22 : i1 to vector<32x16xi1>
      %24 = vector.broadcast %23 : vector<32x16xi1> to vector<32x16xi1>
      %25 = arith.xori %21, %24 : vector<32x16xi1>
      %26 = arith.andi %25, %19 : vector<32x16xi1>
      %27 = vector.broadcast %15 : i32 to vector<32x16xi32>
      %28 = arith.addi %17, %27 : vector<32x16xi32>
      %29 = arith.select %26, %28, %17 : vector<32x16xi1>, vector<32x16xi32>
      %30 = tpu.iota {dimensions = array<i32: 1>} : vector<32x16xi32>
      %31 = arith.cmpi sle, %30, %29 : vector<32x16xi32>
      %cst_12 = arith.constant -2.38197633E+38 : f32
      %32 = vector.broadcast %cst_12 : f32 to vector<32x16xf32>
      %33 = arith.select %31, %12, %32 : vector<32x16xi1>, vector<32x16xf32>
      %c0_13 = arith.constant 0 : index
      %c0_14 = arith.constant 0 : index
      %34 = vector.load %arg11[%c0_13, %c0_14] : memref<32x1xf32, #tpu.memory_space<vmem>>, vector<32x1xf32>
      %cst_15 = arith.constant dense<0xFF800000> : vector<32xf32>
      %35 = vector.multi_reduction <maximumf>, %33, %cst_15 [1] : vector<32x16xf32> to vector<32xf32>
      %36 = vector.shape_cast %35 : vector<32xf32> to vector<32x1xf32>
      %37 = arith.maximumf %34, %36 : vector<32x1xf32>
      %38 = arith.subf %34, %37 : vector<32x1xf32>
      %39 = math.exp %38 : vector<32x1xf32>
      %40 = vector.broadcast %37 : vector<32x1xf32> to vector<32x16xf32>
      %41 = arith.subf %33, %40 : vector<32x16xf32>
      %42 = math.exp %41 : vector<32x16xf32>
      %c0_16 = arith.constant 0 : index
      %c0_17 = arith.constant 0 : index
      %43 = vector.load %arg12[%c0_16, %c0_17] : memref<32x1xf32, #tpu.memory_space<vmem>>, vector<32x1xf32>
      %44 = arith.mulf %39, %43 : vector<32x1xf32>
      %cst_18 = arith.constant dense<0.000000e+00> : vector<32xf32>
      %45 = vector.multi_reduction <add>, %42, %cst_18 [1] : vector<32x16xf32> to vector<32xf32>
      %46 = vector.shape_cast %45 : vector<32xf32> to vector<32x1xf32>
      %47 = arith.addf %44, %46 : vector<32x1xf32>
      %c0_19 = arith.constant 0 : index
      %c0_20 = arith.constant 0 : index
      %48 = vector.load %arg12[%c0_19, %c0_20] : memref<32x1xf32, #tpu.memory_space<vmem>>, vector<32x1xf32>
      tpu.vector_store %arg12[%c0_19, %c0_20], %47 {strides = array<i32>} : memref<32x1xf32, #tpu.memory_space<vmem>>, vector<32x1xf32>,
      %c0_21 = arith.constant 0 : index
      %c0_22 = arith.constant 0 : index
      %49 = vector.load %arg13[%c0_21, %c0_22] : memref<32x128xf32, #tpu.memory_space<vmem>>, vector<32x128xf32>
      %50 = vector.broadcast %39 : vector<32x1xf32> to vector<32x128xf32>
      %51 = arith.mulf %50, %49 : vector<32x128xf32>
      %52 = arith.truncf %42 : vector<32x16xf32> to vector<32x16xbf16>
      %cst_23 = arith.constant dense<0.000000e+00> : vector<32x128xf32>
      %53 = tpu.matmul %52, %10, %cst_23 {dimension_numbers = #tpu.dot_dimension_numbers<[1], [0], [0], [1], [0, 0, 1, 1], [], []>} : vector<32x16xbf16>, vector<16x128xbf16>, vector<32x128xf32> -> vector<32x128xf32>
      %54 = arith.addf %51, %53 : vector<32x128xf32>
      %c0_24 = arith.constant 0 : index
      %c0_25 = arith.constant 0 : index
      %55 = vector.load %arg13[%c0_24, %c0_25] : memref<32x128xf32, #tpu.memory_space<vmem>>, vector<32x128xf32>
      tpu.vector_store %arg13[%c0_24, %c0_25], %54 {strides = array<i32>} : memref<32x128xf32, #tpu.memory_space<vmem>>, vector<32x128xf32>,
      %c0_26 = arith.constant 0 : index
      %c0_27 = arith.constant 0 : index
      %56 = vector.load %arg11[%c0_26, %c0_27] : memref<32x1xf32, #tpu.memory_space<vmem>>, vector<32x1xf32>
      tpu.vector_store %arg11[%c0_26, %c0_27], %37 {strides = array<i32>} : memref<32x1xf32, #tpu.memory_space<vmem>>, vector<32x1xf32>,
      %c0_28 = arith.constant 0 : index
      %c0_29 = arith.constant 0 : index
      %57 = vector.load %arg13[%c0_28, %c0_29] : memref<32x128xf32, #tpu.memory_space<vmem>>, vector<32x128xf32>
      %c0_30 = arith.constant 0 : index
      %c0_31 = arith.constant 0 : index
      %58 = vector.load %arg12[%c0_30, %c0_31] : memref<32x1xf32, #tpu.memory_space<vmem>>, vector<32x1xf32>
      %cst_32 = arith.constant 1.000000e+00 : f32
      %59 = vector.broadcast %cst_32 : f32 to vector<32x1xf32>
      %60 = arith.divf %59, %58 : vector<32x1xf32>
      %61 = vector.broadcast %60 : vector<32x1xf32> to vector<32x128xf32>
      %62 = arith.mulf %57, %61 : vector<32x128xf32>
      %63 = vector.extract_strided_slice %62 {offsets = [0, 0], sizes = [16, 128], strides = [1, 1]} : vector<32x128xf32> to vector<16x128xf32>
      %64 = arith.truncf %63 : vector<16x128xf32> to vector<16x128xbf16>
      %c0_33 = arith.constant 0 : index
      %c0_34 = arith.constant 0 : index
      %65 = vector.load %arg9[%c0_33, %c0_34] : memref<16x256xbf16, #tpu.memory_space<vmem>>, vector<16x128xbf16>
      tpu.vector_store %arg9[%c0_33, %c0_34], %64 {strides = array<i32>} : memref<16x256xbf16, #tpu.memory_space<vmem>>, vector<16x128xbf16>,
      %66 = vector.extract_strided_slice %62 {offsets = [16, 0], sizes = [16, 128], strides = [1, 1]} : vector<32x128xf32> to vector<16x128xf32>
      %67 = arith.truncf %66 : vector<16x128xf32> to vector<16x128xbf16>
      %c0_35 = arith.constant 0 : index
      %c128 = arith.constant 128 : index
      %68 = vector.load %arg9[%c0_35, %c128] : memref<16x256xbf16, #tpu.memory_space<vmem>>, vector<16x128xbf16>
      tpu.vector_store %arg9[%c0_35, %c128], %67 {strides = array<i32>} : memref<16x256xbf16, #tpu.memory_space<vmem>>, vector<16x128xbf16>,
    } else {
    }
    return
  }
  func.func @transform_0(%arg0: i32, %arg1: i32, %arg2: i32, %arg3: i32) -> (i32, i32) {
    %c1_i32 = arith.constant 1 : i32
    %0 = arith.muli %arg0, %c1_i32 : i32
    %1 = arith.addi %0, %arg2 : i32
    %c0_i32 = arith.constant 0 : i32
    return %1, %arg1 : i32, i32
  }
  func.func @transform_1(%arg0: i32, %arg1: i32, %arg2: i32, %arg3: i32) -> (i32, i32) {
    %c1_i32 = arith.constant 1 : i32
    %0 = arith.muli %arg0, %c1_i32 : i32
    %1 = arith.minsi %arg3, %arg2 : i32
    %2 = arith.addi %0, %1 : i32
    %c0_i32 = arith.constant 0 : i32
    return %2, %arg1 : i32, i32
  }
  func.func @transform_2(%arg0: i32, %arg1: i32, %arg2: i32, %arg3: i32) -> (i32, i32) {
    %c1_i32 = arith.constant 1 : i32
    %0 = arith.muli %arg0, %c1_i32 : i32
    %1 = arith.minsi %arg3, %arg2 : i32
    %2 = arith.addi %0, %1 : i32
    %c6_i32 = arith.constant 6 : i32
    %3 = arith.addi %c6_i32, %arg1 : i32
    %c0_i32 = arith.constant 0 : i32
    return %2, %3 : i32, i32
  }
  func.func @transform_3(%arg0: i32, %arg1: i32, %arg2: i32, %arg3: i32) -> (i32, i32) {
    %c0_i32 = arith.constant 0 : i32
    %c0_i32_0 = arith.constant 0 : i32
    return %arg2, %c0_i32 : i32, i32
  }
  func.func @transform_4(%arg0: i32, %arg1: i32, %arg2: i32, %arg3: i32) -> (i32, i32) {
    %c0_i32 = arith.constant 0 : i32
    %c0_i32_0 = arith.constant 0 : i32
    return %arg2, %c0_i32 : i32, i32
  }
  func.func @transform_5(%arg0: i32, %arg1: i32, %arg2: i32, %arg3: i32) -> (i32, i32) {
    %c1_i32 = arith.constant 1 : i32
    %0 = arith.muli %arg0, %c1_i32 : i32
    %1 = arith.addi %0, %arg2 : i32
    %c0_i32 = arith.constant 0 : i32
    return %1, %arg1 : i32, i32
  }
}

module attributes {stable_mosaic.version = 11 : i64} {
  func.func @_mm_kernel(%arg0: i32, %arg1: i32, %arg2: i32, %arg3: memref<32x512xbf16, #tpu.memory_space<vmem>>, %arg4: memref<512x256xbf16, #tpu.memory_space<vmem>>, %arg5: memref<32x256xbf16, #tpu.memory_space<vmem>>, %arg6: memref<32x256xf32, #tpu.memory_space<vmem>>) attributes {dimension_semantics = [#tpu.dimension_semantics<parallel>, #tpu.dimension_semantics<parallel>, #tpu.dimension_semantics<arbitrary>], iteration_bounds = array<i64: 1, 4, 1>, scalar_prefetch = 0 : i64, scratch_operands = 1 : i64, tpu.core_type = #tpu.core_type<tc>, window_params = [{transform_indices = @transform_0, window_bounds = array<i64: 32, 512>}, {transform_indices = @transform_1, window_bounds = array<i64: 512, 256>}, {transform_indices = @transform_2, window_bounds = array<i64: 32, 256>}]} {
    %c0_i32 = arith.constant 0 : i32
    %0 = arith.cmpi eq, %arg2, %c0_i32 : i32
    %1 = arith.extui %0 : i1 to i32
    %c0_i32_0 = arith.constant 0 : i32
    %2 = arith.cmpi ne, %1, %c0_i32_0 : i32
    scf.if %2 {
      %cst_10 = arith.constant 0.000000e+00 : f32
      %12 = vector.broadcast %cst_10 : f32 to vector<32x256xf32>
      %c0_11 = arith.constant 0 : index
      %c0_12 = arith.constant 0 : index
      %13 = vector.load %arg6[%c0_11, %c0_12] : memref<32x256xf32, #tpu.memory_space<vmem>>, vector<32x256xf32>
      tpu.vector_store %arg6[%c0_11, %c0_12], %12 {strides = array<i32>} : memref<32x256xf32, #tpu.memory_space<vmem>>, vector<32x256xf32>,
    } else {
    }
    %c0 = arith.constant 0 : index
    %c0_1 = arith.constant 0 : index
    %3 = vector.load %arg6[%c0, %c0_1] : memref<32x256xf32, #tpu.memory_space<vmem>>, vector<32x256xf32>
    %c0_2 = arith.constant 0 : index
    %c0_3 = arith.constant 0 : index
    %4 = vector.load %arg3[%c0_2, %c0_3] : memref<32x512xbf16, #tpu.memory_space<vmem>>, vector<32x512xbf16>
    %c0_4 = arith.constant 0 : index
    %c0_5 = arith.constant 0 : index
    %5 = vector.load %arg4[%c0_4, %c0_5] : memref<512x256xbf16, #tpu.memory_space<vmem>>, vector<512x256xbf16>
    %cst = arith.constant dense<0.000000e+00> : vector<32x256xf32>
    %6 = tpu.matmul %4, %5, %cst {dimension_numbers = #tpu.dot_dimension_numbers<[1], [0], [0], [1], [0, 0, 1, 1], [], []>} : vector<32x512xbf16>, vector<512x256xbf16>, vector<32x256xf32> -> vector<32x256xf32>
    %7 = arith.addf %3, %6 : vector<32x256xf32>
    %c0_6 = arith.constant 0 : index
    %c0_7 = arith.constant 0 : index
    %8 = vector.load %arg6[%c0_6, %c0_7] : memref<32x256xf32, #tpu.memory_space<vmem>>, vector<32x256xf32>
    tpu.vector_store %arg6[%c0_6, %c0_7], %7 {strides = array<i32>} : memref<32x256xf32, #tpu.memory_space<vmem>>, vector<32x256xf32>,
    %c0_i32_8 = arith.constant 0 : i32
    %9 = arith.cmpi eq, %arg2, %c0_i32_8 : i32
    %10 = arith.extui %9 : i1 to i32
    %c0_i32_9 = arith.constant 0 : i32
    %11 = arith.cmpi ne, %10, %c0_i32_9 : i32
    scf.if %11 {
      %c0_10 = arith.constant 0 : index
      %c0_11 = arith.constant 0 : index
      %12 = vector.load %arg6[%c0_10, %c0_11] : memref<32x256xf32, #tpu.memory_space<vmem>>, vector<32x256xf32>
      %13 = arith.truncf %12 : vector<32x256xf32> to vector<32x256xbf16>
      %c0_12 = arith.constant 0 : index
      %c0_13 = arith.constant 0 : index
      %14 = vector.load %arg5[%c0_12, %c0_13] : memref<32x256xbf16, #tpu.memory_space<vmem>>, vector<32x256xbf16>
      tpu.vector_store %arg5[%c0_12, %c0_13], %13 {strides = array<i32>} : memref<32x256xbf16, #tpu.memory_space<vmem>>, vector<32x256xbf16>,
    } else {
    }
    return
  }
  func.func @transform_0(%arg0: i32, %arg1: i32, %arg2: i32) -> (i32, i32) {
    %c0_i32 = arith.constant 0 : i32
    return %arg0, %arg2 : i32, i32
  }
  func.func @transform_1(%arg0: i32, %arg1: i32, %arg2: i32) -> (i32, i32) {
    %c0_i32 = arith.constant 0 : i32
    return %arg2, %arg1 : i32, i32
  }
  func.func @transform_2(%arg0: i32, %arg1: i32, %arg2: i32) -> (i32, i32) {
    %c0_i32 = arith.constant 0 : i32
    return %arg0, %arg1 : i32, i32
  }
}

module attributes {stable_mosaic.version = 11 : i64} {
  func.func @_rope_k_kernel(%arg0: i32, %arg1: i32, %arg2: memref<16x256xbf16, #tpu.memory_space<vmem>>, %arg3: memref<16x128xf32, #tpu.memory_space<vmem>>, %arg4: memref<16x128xf32, #tpu.memory_space<vmem>>, %arg5: memref<16x256xbf16, #tpu.memory_space<vmem>>) attributes {dimension_semantics = [#tpu.dimension_semantics<parallel>, #tpu.dimension_semantics<parallel>], iteration_bounds = array<i64: 2, 1>, scalar_prefetch = 0 : i64, scratch_operands = 0 : i64, tpu.core_type = #tpu.core_type<tc>, window_params = [{transform_indices = @transform_0, window_bounds = array<i64: 16, 256>}, {transform_indices = @transform_1, window_bounds = array<i64: 16, 128>}, {transform_indices = @transform_2, window_bounds = array<i64: 16, 128>}, {transform_indices = @transform_3, window_bounds = array<i64: 16, 256>}]} {
    %c0 = arith.constant 0 : index
    %c0_0 = arith.constant 0 : index
    %0 = vector.load %arg3[%c0, %c0_0] : memref<16x128xf32, #tpu.memory_space<vmem>>, vector<16x128xf32>
    %c0_1 = arith.constant 0 : index
    %c0_2 = arith.constant 0 : index
    %1 = vector.load %arg4[%c0_1, %c0_2] : memref<16x128xf32, #tpu.memory_space<vmem>>, vector<16x128xf32>
    %c0_3 = arith.constant 0 : index
    %c0_4 = arith.constant 0 : index
    %2 = vector.load %arg2[%c0_3, %c0_4] : memref<16x256xbf16, #tpu.memory_space<vmem>>, vector<16x128xbf16>
    %3 = arith.extf %2 : vector<16x128xbf16> to vector<16x128xf32>
    %4 = arith.mulf %3, %0 : vector<16x128xf32>
    %c64_i32 = arith.constant 64 : i32
    %5 = tpu.dynamic_rotate %3 by %c64_i32 dim 1 : vector<16x128xf32>, i32 -> vector<16x128xf32>
    %6 = arith.mulf %5, %1 : vector<16x128xf32>
    %7 = arith.addf %4, %6 : vector<16x128xf32>
    %8 = arith.truncf %7 : vector<16x128xf32> to vector<16x128xbf16>
    %c0_5 = arith.constant 0 : index
    %c0_6 = arith.constant 0 : index
    %9 = vector.load %arg5[%c0_5, %c0_6] : memref<16x256xbf16, #tpu.memory_space<vmem>>, vector<16x128xbf16>
    tpu.vector_store %arg5[%c0_5, %c0_6], %8 {strides = array<i32>} : memref<16x256xbf16, #tpu.memory_space<vmem>>, vector<16x128xbf16>,
    %c0_7 = arith.constant 0 : index
    %c128 = arith.constant 128 : index
    %10 = vector.load %arg2[%c0_7, %c128] : memref<16x256xbf16, #tpu.memory_space<vmem>>, vector<16x128xbf16>
    %11 = arith.extf %10 : vector<16x128xbf16> to vector<16x128xf32>
    %12 = arith.mulf %11, %0 : vector<16x128xf32>
    %c64_i32_8 = arith.constant 64 : i32
    %13 = tpu.dynamic_rotate %11 by %c64_i32_8 dim 1 : vector<16x128xf32>, i32 -> vector<16x128xf32>
    %14 = arith.mulf %13, %1 : vector<16x128xf32>
    %15 = arith.addf %12, %14 : vector<16x128xf32>
    %16 = arith.truncf %15 : vector<16x128xf32> to vector<16x128xbf16>
    %c0_9 = arith.constant 0 : index
    %c128_10 = arith.constant 128 : index
    %17 = vector.load %arg5[%c0_9, %c128_10] : memref<16x256xbf16, #tpu.memory_space<vmem>>, vector<16x128xbf16>
    tpu.vector_store %arg5[%c0_9, %c128_10], %16 {strides = array<i32>} : memref<16x256xbf16, #tpu.memory_space<vmem>>, vector<16x128xbf16>,
    return
  }
  func.func @transform_0(%arg0: i32, %arg1: i32) -> (i32, i32) {
    %c1_i32 = arith.constant 1 : i32
    %0 = arith.muli %arg0, %c1_i32 : i32
    %1 = arith.addi %0, %arg1 : i32
    %c2_i32 = arith.constant 2 : i32
    %c0_i32 = arith.constant 0 : i32
    return %1, %c2_i32 : i32, i32
  }
  func.func @transform_1(%arg0: i32, %arg1: i32) -> (i32, i32) {
    %c0_i32 = arith.constant 0 : i32
    %c0_i32_0 = arith.constant 0 : i32
    return %arg1, %c0_i32 : i32, i32
  }
  func.func @transform_2(%arg0: i32, %arg1: i32) -> (i32, i32) {
    %c0_i32 = arith.constant 0 : i32
    %c0_i32_0 = arith.constant 0 : i32
    return %arg1, %c0_i32 : i32, i32
  }
  func.func @transform_3(%arg0: i32, %arg1: i32) -> (i32, i32) {
    %c1_i32 = arith.constant 1 : i32
    %0 = arith.muli %arg0, %c1_i32 : i32
    %1 = arith.addi %0, %arg1 : i32
    %c0_i32 = arith.constant 0 : i32
    %c0_i32_0 = arith.constant 0 : i32
    return %1, %c0_i32 : i32, i32
  }
}

module attributes {stable_mosaic.version = 11 : i64} {
  func.func @_mm_kernel(%arg0: i32, %arg1: i32, %arg2: i32, %arg3: memref<32x512xbf16, #tpu.memory_space<vmem>>, %arg4: memref<512x256xbf16, #tpu.memory_space<vmem>>, %arg5: memref<32x256xf32, #tpu.memory_space<vmem>>, %arg6: memref<32x256xf32, #tpu.memory_space<vmem>>) attributes {dimension_semantics = [#tpu.dimension_semantics<parallel>, #tpu.dimension_semantics<parallel>, #tpu.dimension_semantics<arbitrary>], iteration_bounds = array<i64: 1, 2, 1>, scalar_prefetch = 0 : i64, scratch_operands = 1 : i64, tpu.core_type = #tpu.core_type<tc>, window_params = [{transform_indices = @transform_0, window_bounds = array<i64: 32, 512>}, {transform_indices = @transform_1, window_bounds = array<i64: 512, 256>}, {transform_indices = @transform_2, window_bounds = array<i64: 32, 256>}]} {
    %c0_i32 = arith.constant 0 : i32
    %0 = arith.cmpi eq, %arg2, %c0_i32 : i32
    %1 = arith.extui %0 : i1 to i32
    %c0_i32_0 = arith.constant 0 : i32
    %2 = arith.cmpi ne, %1, %c0_i32_0 : i32
    scf.if %2 {
      %cst_10 = arith.constant 0.000000e+00 : f32
      %12 = vector.broadcast %cst_10 : f32 to vector<32x256xf32>
      %c0_11 = arith.constant 0 : index
      %c0_12 = arith.constant 0 : index
      %13 = vector.load %arg6[%c0_11, %c0_12] : memref<32x256xf32, #tpu.memory_space<vmem>>, vector<32x256xf32>
      tpu.vector_store %arg6[%c0_11, %c0_12], %12 {strides = array<i32>} : memref<32x256xf32, #tpu.memory_space<vmem>>, vector<32x256xf32>,
    } else {
    }
    %c0 = arith.constant 0 : index
    %c0_1 = arith.constant 0 : index
    %3 = vector.load %arg6[%c0, %c0_1] : memref<32x256xf32, #tpu.memory_space<vmem>>, vector<32x256xf32>
    %c0_2 = arith.constant 0 : index
    %c0_3 = arith.constant 0 : index
    %4 = vector.load %arg3[%c0_2, %c0_3] : memref<32x512xbf16, #tpu.memory_space<vmem>>, vector<32x512xbf16>
    %c0_4 = arith.constant 0 : index
    %c0_5 = arith.constant 0 : index
    %5 = vector.load %arg4[%c0_4, %c0_5] : memref<512x256xbf16, #tpu.memory_space<vmem>>, vector<512x256xbf16>
    %cst = arith.constant dense<0.000000e+00> : vector<32x256xf32>
    %6 = tpu.matmul %4, %5, %cst {dimension_numbers = #tpu.dot_dimension_numbers<[1], [0], [0], [1], [0, 0, 1, 1], [], []>} : vector<32x512xbf16>, vector<512x256xbf16>, vector<32x256xf32> -> vector<32x256xf32>
    %7 = arith.addf %3, %6 : vector<32x256xf32>
    %c0_6 = arith.constant 0 : index
    %c0_7 = arith.constant 0 : index
    %8 = vector.load %arg6[%c0_6, %c0_7] : memref<32x256xf32, #tpu.memory_space<vmem>>, vector<32x256xf32>
    tpu.vector_store %arg6[%c0_6, %c0_7], %7 {strides = array<i32>} : memref<32x256xf32, #tpu.memory_space<vmem>>, vector<32x256xf32>,
    %c0_i32_8 = arith.constant 0 : i32
    %9 = arith.cmpi eq, %arg2, %c0_i32_8 : i32
    %10 = arith.extui %9 : i1 to i32
    %c0_i32_9 = arith.constant 0 : i32
    %11 = arith.cmpi ne, %10, %c0_i32_9 : i32
    scf.if %11 {
      %c0_10 = arith.constant 0 : index
      %c0_11 = arith.constant 0 : index
      %12 = vector.load %arg6[%c0_10, %c0_11] : memref<32x256xf32, #tpu.memory_space<vmem>>, vector<32x256xf32>
      %c0_12 = arith.constant 0 : index
      %c0_13 = arith.constant 0 : index
      %13 = vector.load %arg5[%c0_12, %c0_13] : memref<32x256xf32, #tpu.memory_space<vmem>>, vector<32x256xf32>
      tpu.vector_store %arg5[%c0_12, %c0_13], %12 {strides = array<i32>} : memref<32x256xf32, #tpu.memory_space<vmem>>, vector<32x256xf32>,
    } else {
    }
    return
  }
  func.func @transform_0(%arg0: i32, %arg1: i32, %arg2: i32) -> (i32, i32) {
    %c0_i32 = arith.constant 0 : i32
    return %arg0, %arg2 : i32, i32
  }
  func.func @transform_1(%arg0: i32, %arg1: i32, %arg2: i32) -> (i32, i32) {
    %c0_i32 = arith.constant 0 : i32
    return %arg2, %arg1 : i32, i32
  }
  func.func @transform_2(%arg0: i32, %arg1: i32, %arg2: i32) -> (i32, i32) {
    %c0_i32 = arith.constant 0 : i32
    return %arg0, %arg1 : i32, i32
  }
}

</mosaic_0001>

<bundles_post_ra>
// kernel: rope_gqa_attention.5
= control target key start
LH: loop header
LB: loop body
LE: loop exit
PB: predicated region body
PF: predicated region fallthrough
CT: control target
= control target key end

     0   :  { %s582_s12 = smov 0   ;;  %s584_s13 = smov 0   ;;  %s659_s0 = inlined_call_operand.vmem [shape: bf16[32,1024], index: 0, kind: input, shape index: {}]   ;;  %s660_s1 = inlined_call_operand.vmem [shape: f32[16,128], index: 1, kind: input, shape index: {}]   ;;  %s661_s2 = inlined_call_operand.vmem [shape: f32[16,128], index: 2, kind: input, shape index: {}]   ;;  %s662_s3 = inlined_call_operand.vmem [shape: bf16[32,256], index: 3, kind: output, shape index: {}]  }
   0x1   :  { %s586_s14 = smov 0   ;;  %s588_s15 = smov 0  }
   0x2   :  { %s590_s16 = smov 0  }
   0x3 LB: > { %s25_s17 = sadd.s32 1, %s555_s15  ;;  %p41_p1 = scmp.ne.s32.totalorder %s547_s13, %s543_s12  ;;  %s559_s16 = sphi %s590_s16, %s13_s16   ;;  %s555_s15 = sphi %s588_s15, %s666_s15   ;;  %s551_s14 = sphi %s586_s14, %s665_s14   ;;  %s547_s13 = sphi %s584_s13, %s664_s13   ;;  %s543_s12 = sphi %s582_s12, %s663_s12  }
   0x4   : > { %p27_p0 = scmp.ge.s32.totalorder %s25_s17, 2  ;;  %p42_p2 = scmp.eq.s32.totalorder %s559_s16, 0 }
   0x5   : > { %s34_s19 = sadd.s32 1, %s547_s13  ;;  %p447_p5 = scmp.ge.s32.totalorder %s559_s16, 2 }
   0x6   : > { %s668_s17 = smov (%p27_p0, %s25_s17), 0  ;;  %p43_p3 = por %p42_p2, %p41_p1 }
   0x7   : > { %s31_s18 = ssub.s32 %s555_s15, %s668_s17  ;;  %165 = sbr.rel (%p447_p5) target bundleno = 21 (0x15), region = 24 }
   0x8   : > { %p32_p4 = scmp.eq.s32.totalorder %s31_s18, 0 }
   0xa   : > { %s617_s20 = scalar_select %p32_p4, %s547_s13, %s34_s19  }
   0xe   : > { %168 = sbr.rel (!%p43_p3) target bundleno = 21 (0x15), region = 28  ;;  %s170_s21 = sand.u32 (%p43_p3), 1, %s547_s13  }
   0xf   : > { %s464_s22 = sshll.u32 (%p43_p3), %s555_s15, 6  ;;  %s448_s23 = sshll.u32 (%p43_p3), %s170_s21, 4 }
  0x10   : > { %s369_s26 = scalar_lea.vmem (%p43_p3), %s659_s0, %s464_s22  ;;  %s172_s27 = scalar_lea.vmem (%p43_p3), [#allocation2], %s448_s23 }
  0x11   : > { %v451_v0 = vld [vmem:[%s369_s26 + $0x10] sm:$0xff] (%p43_p3) }
  0x12   : > { %v452_v1 = vld [vmem:[%s369_s26 + $0x30] sm:$0xff] (%p43_p3)  ;;  %209 = vst [vmem:[%s172_s27] sm:$0xff] (%p43_p3), %v451_v0 }
  0x13   : > { %211 = vst [vmem:[%s172_s27 + $0x8] sm:$0xff] (%p43_p3), %v452_v1 }
  0x15 PF: > { %p453_p6 = scmp.ge.s32.totalorder %s559_s16, 1  ;;  %p216_p7 = scmp.lt.s32.totalorder %s559_s16, 3 }
  0x17   : > { %p217_p8 = pnand %p453_p6, %p216_p7 }
  0x18   : > { %s223_s28 = sand.u32 (!%p217_p8), 1, %s543_s12   ;;  %s561_s4 = smov (!%p217_p8), 64   ;;  %v281_v10 = vld [vmem:[%s660_s1] sm:$0xff] (!%p217_p8)  ;;  %v282_v17 = vld [vmem:[%s660_s1 + $0x8] sm:$0xff] (!%p217_p8) }
  0x19   : > { %220 = sbr.rel (%p217_p8) target bundleno = 160 (0xa0), region = 66  ;;  %s454_s29 = sshll.u32 (!%p217_p8), %s223_s28, 4  ;;  %v283_v11 = vld [vmem:[%s661_s2] sm:$0xff] (!%p217_p8)  ;;  %v284_v20 = vld [vmem:[%s661_s2 + $0x8] sm:$0xff] (!%p217_p8) }
  0x1a   : > { %s225_s30 = scalar_lea.vmem (!%p217_p8), [#allocation2], %s454_s29  ;;  %s455_s5 = sshll.u32 (!%p217_p8), %s551_s14, 1 }
  0x1b   : > { %v285_v2 = vld [vmem:[%s225_s30] sm:$0xff] (!%p217_p8)   ;;  %v286_v3 = vld [vmem:[%s225_s30 + $0x8] sm:$0xff] (!%p217_p8)   ;;  %p274_p9 = scmp.lt.s32.totalorder (!%p217_p8), %s455_s5, 3 }
  0x1c   : > { %v287_v4 = vunpack.c.l.bf16 (!%p217_p8), %v285_v2  ;;  %v311_v5 = vunpack.c.h.bf16 (!%p217_p8), %v285_v2  ;;  %v288_v6 = vunpack.c.l.bf16 (!%p217_p8), %v286_v3  ;;  %v312_v7 = vunpack.c.h.bf16 (!%p217_p8), %v286_v3 }
  0x1e   : > { %v511_v8 = vpack.i.bf16 (!%p217_p8), %v311_v5, %v287_v4  ;;  %v516_v9 = vpack.i.bf16 (!%p217_p8), %v312_v7, %v288_v6  ;;  %v313_v13 = vmul.f32 (!%p217_p8), %v311_v5, %v281_v10  ;;  %v289_v14 = vmul.f32 (!%p217_p8), %v287_v4, %v281_v10 }
  0x1f   : > { %v290_v21 = vmul.f32 (!%p217_p8), %v288_v6, %v282_v17  ;;  %v314_v22 = vmul.f32 (!%p217_p8), %v312_v7, %v282_v17 }
  0x20   : > { %512 = vrot.lane.b32.xlu0 %v511_v8, %s561_s4  ;;  %s670_s5 = smov (!%p274_p9, %s455_s5), 3 }
  0x21   : > { %s465_s12 = sshll.u32 %s670_s5, 3 }
  0x22   : > { %s278_s22 = scalar_lea.vmem %s662_s3, %s465_s12 }
  0x24   : > { %517 = vrot.lane.b32.xlu0 %v516_v9, %s561_s4 }
  0x92   : > { %v513_v12 = vpop.permute.xlu0 %512 }
  0x93   : > { %v515_v15 = vunpack.i.h.bf16 %v513_v12  ;;  %v514_v16 = vunpack.i.l.bf16 %v513_v12 }
  0x95   : > { %v319_v18 = vmul.f32 %v515_v15, %v283_v11  ;;  %v295_v19 = vmul.f32 %v514_v16, %v283_v11 }
  0x96   : > { %v518_v23 = vpop.permute.xlu0 %517 }
  0x97   : > { %v321_v24 = vadd.f32 %v319_v18, %v313_v13  ;;  %v297_v25 = vadd.f32 %v295_v19, %v289_v14  ;;  %v520_v26 = vunpack.i.h.bf16 %v518_v23  ;;  %v519_v27 = vunpack.i.l.bf16 %v518_v23 }
  0x99   : > { %v468_v28 = vpack.c.bf16 %v321_v24, %v321_v24  ;;  %v466_v29 = vpack.c.bf16 %v297_v25, %v297_v25  ;;  %v320_v30 = vmul.f32 %v520_v26, %v284_v20  ;;  %v296_v31 = vmul.f32 %v519_v27, %v284_v20 }
  0x9b   : > { %331 = vst [vmem:[%s278_s22 + $0x4] sm:$0xf] %v468_v28  ;;  %307 = vst [vmem:[%s278_s22] sm:$0xf] %v466_v29  ;;  %v322_v32 = vadd.f32 %v320_v30, %v314_v22  ;;  %v298_v33 = vadd.f32 %v296_v31, %v290_v21 }
  0x9d   : > { %v469_v34 = vpack.c.bf16 %v322_v32, %v322_v32  ;;  %v467_v35 = vpack.c.bf16 %v298_v33, %v298_v33 }
  0x9f   : > { %308 = vst [vmem:[%s278_s22 + $0x8] sm:$0xf] %v467_v35  ;;  %332 = vst [vmem:[%s278_s22 + $0xc] sm:$0xf] %v469_v34 }
  0xa0 PF: > { %s13_s16 = sadd.s32 1, %s559_s16   ;;  %s663_s12 = smov %s547_s13 }
  0xa1   : > { %p10_p10 = scmp.ge.s32.totalorder %s13_s16, 4   ;;  %s664_s13 = smov %s617_s20 }
  0xa2   : > { %s665_s14 = smov %s555_s15  ;;  %s666_s15 = smov %s668_s17 }
  0xa3   :  { %12 = sbr.rel (!%p10_p10) target bundleno = 3 (0x3), region = 111 }

// kernel: rope_gqa_attention.4
= control target key start
LH: loop header
LB: loop body
LE: loop exit
PB: predicated region body
PF: predicated region fallthrough
CT: control target
= control target key end

     0   :  { %7 = vsyncpa [#allocation4], 0  ;;  %s1598_s0 = inlined_call_operand.vmem [shape: bf16[32,512], index: 0, kind: input, shape index: {}]   ;;  %s1599_s1 = inlined_call_operand.hbm [shape: bf16[512,1024], index: 1, kind: input, shape index: {}]   ;;  %s1600_s2 = inlined_call_operand.vmem [shape: bf16[32,1024], index: 2, kind: output, shape index: {}]  }
   0x1   :  { %9 = vsyncpa [#allocation4 + $0x1], 0  ;;  %s1372_s9 = smov 0   ;;  %s1374_s10 = smov 0  }
   0x2   :  { %s1376_s11 = smov 0   ;;  %s1378_s12 = smov 0  }
   0x3   :  { %s1380_s13 = smov 0   ;;  %s1382_s14 = smov 0  }
   0x4 LB: > { %s999_s15 = sadd.s32 4294967295, %s1351_s14   ;;  %s30_s16 = sadd.s32 1, %s1347_s13  ;;  %s1351_s14 = sphi %s1382_s14, %s15_s14   ;;  %s1347_s13 = sphi %s1380_s13, %s1611_s13   ;;  %s1343_s12 = sphi %s1378_s12, %s1610_s12   ;;  %s1339_s11 = sphi %s1376_s11, %s1609_s11   ;;  %s1335_s10 = sphi %s1374_s10, %s1608_s10   ;;  %s1331_s9 = sphi %s1372_s9, %s1607_s9  }
   0x5   : > { %p32_p0 = scmp.ge.s32.totalorder %s30_s16, 4  ;;  %s71_s17 = sadd.s32 1, %s1339_s11 }
   0x6   : > { %p78_p1 = scmp.ne.s32.totalorder %s1339_s11, %s1335_s10  ;;  %p79_p2 = scmp.eq.s32.totalorder %s1351_s14, 0 }
   0x7   : > { %s1613_s16 = smov (%p32_p0, %s30_s16), 0  ;;  %p84_p4 = scmp.ne.s32.totalorder %s1335_s10, %s1331_s9 }
   0x8   : > { %p1408_p3 = por %p79_p2, %p78_p1  ;;  %s67_s19 = ssub.s32 %s1347_s13, %s1613_s16 }
   0x9   : > { %p85_p5 = scmp.eq.s32.totalorder %s999_s15, 0  ;;  %p69_p6 = scmp.eq.s32.totalorder %s67_s19, 0 }
   0xa   : > { %p110_p7 = scmp.eq.s32.totalorder %s999_s15, 3  ;;  %p1111_p10 = scmp.lt.s32.totalorder %s1351_s14, 4 }
   0xb   : > { %p1415_p8 = por %p85_p5, %p84_p4  ;;  %s151_s23 = sand.u32 1, %s1339_s11  }
   0xc   : > { %s1420_s21 = scalar_select %p69_p6, %s1339_s11, %s71_s17  }
   0xd   : > { %p1422_p9 = por %p110_p7, %p78_p1  ;;  %s1091_s24 = sshll.u32 %s1347_s13, 7 }
   0xe   : > { %s1004_s25 = sshll.u32 %s151_s23, 9  ;;  %s1432_s28 = scalar_lea.hbm %s1599_s1, %s1091_s24 }
   0xf   : > { %s1603_s22 = scalar_select %p1422_p9, 1, 0 }
  0x10   : > { %s155_s29 = scalar_lea.vmem [#allocation3], %s1004_s25  ;;  %p1436_p11 = pnand %p1111_p10, %p1408_p3 }
  0x11   : > { %s165_s30 = sshll.u32 %s155_s29, 4  ;;  %s1443_s4 = scalar_lea.sflag [#allocation4], %s151_s23  ;;  %s1440_s30 = int_to_ptr.vmem [resolvable:$true] %s165_s30 }
  0x12   : > { %s1271_s5 = scalar_lea.hbm %s1432_s28, 8192  ;;  %p1273_p0 = pneg %p1436_p11 }
  0x13   : > { %p1272_p13 = scmp.ne.s32.totalorder %s1432_s28, %s1271_s5  ;;  %s1276_s8 = scalar_lea.hbm %s1599_s1, 32768 }
  0x14   : > { %p1277_p3 = scmp.lt.u32.totalorder %s1432_s28, %s1599_s1  ;;  %p1278_p4 = scmp.lt.u32.totalorder %s1276_s8, %s1271_s5 }
  0x15   : > { %p1274_p1 = pnand %p1273_p0, %p1272_p13  ;;  %p1280_p6 = scmp.lt.u32.totalorder %s1271_s5, %s1432_s28 }
  0x16   : > { %p1279_p5 = por %p1278_p4, %p1277_p3 }
  0x17   : > { %p1275_p2 = pneg %p1274_p1 }
  0x18   : > { %p1281_p7 = por %p1280_p6, %p1279_p5 }
  0x1a   : > { %p1282_p10 = pnand %p1281_p7, %p1275_p2 }
  0x1c   : > { %1285 = shalt.err (!%p1282_p10)
}
  0x1d   : > { %s1286_s17 = scalar_lea.vmem %s1440_s30, 8192  ;;  %s1353_s18 = smov [#allocation3]  }
  0x1e   : > { %p1287_p13 = scmp.ne.s32.totalorder %s1440_s30, %s1286_s17  ;;  %s1291_s19 = sshll.u32 %s1353_s18, 4  ;;  %s1292_s19 = int_to_ptr.vmem [resolvable:$false] %s1291_s19 }
  0x1f   : > { %s1293_s23 = scalar_lea.vmem %s1292_s19, 16384  ;;  %p1294_p9 = scmp.lt.s32.totalorder %s1440_s30, %s1292_s19 }
  0x20   : > { %p1289_p1 = pnand %p1287_p13, %p1273_p0  ;;  %p1295_p3 = scmp.lt.s32.totalorder %s1293_s23, %s1286_s17 }
  0x22   : > { %p1290_p12 = pneg %p1289_p1  ;;  %p1296_p4 = por %p1295_p3, %p1294_p9 }
  0x24   : > { %p1297_p5 = pnand %p1296_p4, %p1290_p12 }
  0x26   : > { %1300 = shalt.err (!%p1297_p5)
}
  0x27   : > { %s1354_s24 = smov 512   ;;  %s1355_s25 = smov 128  }
  0x28   : > { %s1356_s26 = smov 8   ;;  %p173_p0 = scmp.lt.s32.totalorder %s1351_s14, 5 }
  0x29   : > { %1110 = dma.hbm_to_vmem [thread:$0]  (!%p1436_p11), %s1432_s28, 8192, %s1440_s30, %s1443_s4, %s1354_s24, %s1355_s25, %s1356_s26  }
  0x2a   : > { %p1605_p2 = scmp.ge.s32.totalorder %s1351_s14, 1 }
  0x2c   : > { %p174_p6 = pnand %p1605_p2, %p173_p0 }
  0x2d   : > { %s1475_s27 = sand.u32 (!%p174_p6), 1, %s1335_s10  }
  0x2e   : > { %177 = sbr.rel (%p174_p6) target bundleno = 356 (0x164), region = 28  ;;  %s1008_s29 = sshll.u32 (!%p174_p6), %s1475_s27, 9 }
  0x2f   : > { %s180_s5 = scalar_lea.sflag (!%p174_p6), [#allocation4], %s1475_s27  ;;  %s1479_s6 = scalar_lea.vmem (!%p174_p6), [#allocation3], %s1008_s29 }
  0x35   : > { %1326 = dma.done.wait (%p1415_p8), %s180_s5, 8192  }
  0x36   : > { %1328 = vsyncadd (%p1415_p8), %s180_s5, 4294959104  ;;  %v1163_v0 = vld [vmem:[%s1479_s6 + $0x4] ss:$8 sps:$4 sm:$0xff]   ;;  %v1167_v2 = vld [vmem:[%s1479_s6] ss:$8 sps:$4 sm:$0xff]   ;;  %s1009_s29 = sshll.u32 %s1475_s27, 5 }
  0x37   : > { %v1165_v1 = vld [vmem:[%s1479_s6 + $0x104] ss:$8 sps:$4 sm:$0xff]   ;;  %681 = vmatprep.subr.bf16.mxu1 %v1163_v0  ;;  %v1168_v3 = vld [vmem:[%s1479_s6 + $0x100] ss:$8 sps:$4 sm:$0xff]   ;;  %v1169_v4 = vld [vmem:[%s1479_s6 + $0x14] ss:$8 sps:$4 sm:$0xff]  }
  0x38   : > { %734 = vmatprep.subr.bf16.mxu0 %v1165_v1  ;;  %682 = vmatpush1.bf16.msra.mxu1 %v1167_v2  ;;  %v1171_v5 = vld [vmem:[%s1479_s6 + $0x114] ss:$8 sps:$4 sm:$0xff]   ;;  %v1173_v6 = vld [vmem:[%s1479_s6 + $0x10] ss:$8 sps:$4 sm:$0xff]   ;;  %v1175_v8 = vld [vmem:[%s1479_s6 + $0x24] ss:$8 sps:$4 sm:$0xff]  }
  0x39   : > { %735 = vmatpush1.bf16.msra.mxu0 %v1168_v3  ;;  %683 = vmatprep.subr.bf16.mxu1 %v1169_v4  ;;  %v1174_v7 = vld [vmem:[%s1479_s6 + $0x110] ss:$8 sps:$4 sm:$0xff]   ;;  %v1177_v9 = vld [vmem:[%s1479_s6 + $0x124] ss:$8 sps:$4 sm:$0xff]   ;;  %v1179_v10 = vld [vmem:[%s1479_s6 + $0x20] ss:$8 sps:$4 sm:$0xff]  }
  0x3a   : > { %736 = vmatprep.subr.bf16.mxu0 %v1171_v5  ;;  %v1180_v11 = vld [vmem:[%s1479_s6 + $0x120] ss:$8 sps:$4 sm:$0xff]   ;;  %v1181_v12 = vld [vmem:[%s1479_s6 + $0x34] ss:$8 sps:$4 sm:$0xff]   ;;  %v1185_v14 = vld [vmem:[%s1479_s6 + $0x30] ss:$8 sps:$4 sm:$0xff]  }
  0x3b   : > { %v1183_v13 = vld [vmem:[%s1479_s6 + $0x134] ss:$8 sps:$4 sm:$0xff]   ;;  %v1186_v15 = vld [vmem:[%s1479_s6 + $0x130] ss:$8 sps:$4 sm:$0xff]   ;;  %v1187_v16 = vld [vmem:[%s1479_s6 + $0x44] ss:$8 sps:$4 sm:$0xff]  }
  0x3c   : > { %684 = vmatpush1.bf16.msra.mxu1 %v1173_v6  ;;  %v1189_v17 = vld [vmem:[%s1479_s6 + $0x144] ss:$8 sps:$4 sm:$0xff]   ;;  %v1191_v18 = vld [vmem:[%s1479_s6 + $0x40] ss:$8 sps:$4 sm:$0xff]   ;;  %v1193_v20 = vld [vmem:[%s1479_s6 + $0x54] ss:$8 sps:$4 sm:$0xff]  }
  0x3d   : > { %737 = vmatpush1.bf16.msra.mxu0 %v1174_v7  ;;  %685 = vmatprep.subr.bf16.mxu1 %v1175_v8  ;;  %v1192_v19 = vld [vmem:[%s1479_s6 + $0x140] ss:$8 sps:$4 sm:$0xff]   ;;  %v1195_v21 = vld [vmem:[%s1479_s6 + $0x154] ss:$8 sps:$4 sm:$0xff]   ;;  %v1197_v22 = vld [vmem:[%s1479_s6 + $0x50] ss:$8 sps:$4 sm:$0xff]  }
  0x3e   : > { %738 = vmatprep.subr.bf16.mxu0 %v1177_v9  ;;  %v1198_v23 = vld [vmem:[%s1479_s6 + $0x150] ss:$8 sps:$4 sm:$0xff]   ;;  %v1199_v24 = vld [vmem:[%s1479_s6 + $0x64] ss:$8 sps:$4 sm:$0xff]   ;;  %v1203_v26 = vld [vmem:[%s1479_s6 + $0x60] ss:$8 sps:$4 sm:$0xff]  }
  0x3f   : > { %v1201_v25 = vld [vmem:[%s1479_s6 + $0x164] ss:$8 sps:$4 sm:$0xff]   ;;  %v1204_v27 = vld [vmem:[%s1479_s6 + $0x160] ss:$8 sps:$4 sm:$0xff]   ;;  %v1205_v28 = vld [vmem:[%s1479_s6 + $0x74] ss:$8 sps:$4 sm:$0xff]  }
  0x40   : > { %686 = vmatpush1.bf16.msra.mxu1 %v1179_v10  ;;  %v1207_v29 = vld [vmem:[%s1479_s6 + $0x174] ss:$8 sps:$4 sm:$0xff]   ;;  %v1209_v30 = vld [vmem:[%s1479_s6 + $0x70] ss:$8 sps:$4 sm:$0xff]   ;;  %v1211_v32 = vld [vmem:[%s1479_s6 + $0x84] ss:$8 sps:$4 sm:$0xff]  }
  0x41   : > { %739 = vmatpush1.bf16.msra.mxu0 %v1180_v11  ;;  %687 = vmatprep.subr.bf16.mxu1 %v1181_v12  ;;  %v1210_v31 = vld [vmem:[%s1479_s6 + $0x170] ss:$8 sps:$4 sm:$0xff]   ;;  %v1213_v33 = vld [vmem:[%s1479_s6 + $0x184] ss:$8 sps:$4 sm:$0xff]   ;;  %v1215_v34 = vld [vmem:[%s1479_s6 + $0x80] ss:$8 sps:$4 sm:$0xff]  }
  0x42   : > { %740 = vmatprep.subr.bf16.mxu0 %v1183_v13  ;;  %v1216_v35 = vld [vmem:[%s1479_s6 + $0x180] ss:$8 sps:$4 sm:$0xff]   ;;  %v1217_v36 = vld [vmem:[%s1479_s6 + $0x94] ss:$8 sps:$4 sm:$0xff]   ;;  %v1221_v38 = vld [vmem:[%s1479_s6 + $0x90] ss:$8 sps:$4 sm:$0xff]  }
  0x43   : > { %v1219_v37 = vld [vmem:[%s1479_s6 + $0x194] ss:$8 sps:$4 sm:$0xff]   ;;  %v1222_v39 = vld [vmem:[%s1479_s6 + $0x190] ss:$8 sps:$4 sm:$0xff]   ;;  %v1223_v40 = vld [vmem:[%s1479_s6 + $0xa4] ss:$8 sps:$4 sm:$0xff]  }
  0x44   : > { %688 = vmatpush1.bf16.msra.mxu1 %v1185_v14  ;;  %v1225_v41 = vld [vmem:[%s1479_s6 + $0x1a4] ss:$8 sps:$4 sm:$0xff]   ;;  %v1227_v42 = vld [vmem:[%s1479_s6 + $0xa0] ss:$8 sps:$4 sm:$0xff]   ;;  %v1229_v44 = vld [vmem:[%s1479_s6 + $0xb4] ss:$8 sps:$4 sm:$0xff]  }
  0x45   : > { %741 = vmatpush1.bf16.msra.mxu0 %v1186_v15  ;;  %689 = vmatprep.subr.bf16.mxu1 %v1187_v16  ;;  %v1228_v43 = vld [vmem:[%s1479_s6 + $0x1a0] ss:$8 sps:$4 sm:$0xff]   ;;  %v1231_v45 = vld [vmem:[%s1479_s6 + $0x1b4] ss:$8 sps:$4 sm:$0xff]   ;;  %v1233_v46 = vld [vmem:[%s1479_s6 + $0xb0] ss:$8 sps:$4 sm:$0xff]  }
  0x46   : > { %742 = vmatprep.subr.bf16.mxu0 %v1189_v17  ;;  %v1234_v47 = vld [vmem:[%s1479_s6 + $0x1b0] ss:$8 sps:$4 sm:$0xff]   ;;  %v1235_v48 = vld [vmem:[%s1479_s6 + $0xc4] ss:$8 sps:$4 sm:$0xff]   ;;  %v1239_v52 = vld [vmem:[%s1479_s6 + $0xc0] ss:$8 sps:$4 sm:$0xff]  }
  0x47   : > { %v1261_v49 = vld [vmem:[%s1598_s0 + $0x4] ss:$16 sps:$4 sm:$0xff]   ;;  %v1264_v51 = vld [vmem:[%s1598_s0 + $0xc] ss:$16 sps:$4 sm:$0xff]   ;;  %v1240_v53 = vld [vmem:[%s1479_s6 + $0x1c0] ss:$8 sps:$4 sm:$0xff]  }
  0x48   : > { %690 = vmatpush1.bf16.msra.mxu1 %v1191_v18  ;;  %v1237_v50 = vld [vmem:[%s1479_s6 + $0x1c4] ss:$8 sps:$4 sm:$0xff]   ;;  %713 = vmatprep.mubr.bf16.mxu1 %v1261_v49  ;;  %v1241_v54 = vld [vmem:[%s1479_s6 + $0xd4] ss:$8 sps:$4 sm:$0xff]   ;;  %v1245_v56 = vld [vmem:[%s1479_s6 + $0xd0] ss:$8 sps:$4 sm:$0xff]  }
  0x49   : > { %743 = vmatpush1.bf16.msra.mxu0 %v1192_v19  ;;  %691 = vmatprep.subr.bf16.mxu1 %v1193_v20  ;;  %v1243_v55 = vld [vmem:[%s1479_s6 + $0x1d4] ss:$8 sps:$4 sm:$0xff]   ;;  %v1246_v57 = vld [vmem:[%s1479_s6 + $0x1d0] ss:$8 sps:$4 sm:$0xff]   ;;  %v1247_v58 = vld [vmem:[%s1479_s6 + $0xe4] ss:$8 sps:$4 sm:$0xff]  }
  0x4a   : > { %744 = vmatprep.subr.bf16.mxu0 %v1195_v21  ;;  %766 = vmatprep.mubr.bf16.mxu0 %v1264_v51  ;;  %v1249_v59 = vld [vmem:[%s1479_s6 + $0x1e4] ss:$8 sps:$4 sm:$0xff]   ;;  %v1251_v60 = vld [vmem:[%s1479_s6 + $0xe0] ss:$8 sps:$4 sm:$0xff]   ;;  %v1253_v62 = vld [vmem:[%s1479_s6 + $0xf4] ss:$8 sps:$4 sm:$0xff]  }
  0x4b   : > { %v1252_v61 = vld [vmem:[%s1479_s6 + $0x1e0] ss:$8 sps:$4 sm:$0xff]   ;;  %v1255_v63 = vld [vmem:[%s1479_s6 + $0x1f4] ss:$8 sps:$4 sm:$0xff]   ;;  %v1257_v0 = vld [vmem:[%s1479_s6 + $0xf0] ss:$8 sps:$4 sm:$0xff]  }
  0x4c   : > { %692 = vmatpush1.bf16.msra.mxu1 %v1197_v22  ;;  %v1258_v1 = vld [vmem:[%s1479_s6 + $0x1f0] ss:$8 sps:$4 sm:$0xff]   ;;  %v1265_v4 = vld [vmem:[%s1598_s0 + $0x24] ss:$16 sps:$4 sm:$0xff]   ;;  %v1267_v5 = vld [vmem:[%s1598_s0 + $0x2c] ss:$16 sps:$4 sm:$0xff]  }
  0x4d   : > { %745 = vmatpush1.bf16.msra.mxu0 %v1198_v23  ;;  %693 = vmatprep.subr.bf16.mxu1 %v1199_v24  ;;  %v1259_v2 = vld [vmem:[%s1598_s0] ss:$16 sps:$4 sm:$0xff]   ;;  %v1262_v3 = vld [vmem:[%s1598_s0 + $0x8] ss:$16 sps:$4 sm:$0xff]   ;;  %s212_s5 = scalar_lea.vmem [#allocation5], %s1009_s29  ;;  %p1606_p8 = scmp.ne.s32.totalorder %s1603_s22, 0 }
  0x4e   : > { %746 = vmatprep.subr.bf16.mxu0 %v1201_v25  ;;  %v1269_v6 = vld [vmem:[%s1598_s0 + $0x20] ss:$16 sps:$4 sm:$0xff]   ;;  %v1270_v7 = vld [vmem:[%s1598_s0 + $0x28] ss:$16 sps:$4 sm:$0xff]   ;;  %s1096_s27 = sshll.u32 (%p1606_p8), %s1343_s12, 3 }
  0x4f   : > { %s854_s28 = scalar_lea.vmem (%p1606_p8), %s1600_s2, %s1096_s27 }
  0x50   : > { %694 = vmatpush1.bf16.msra.mxu1 %v1203_v26 }
  0x51   : > { %747 = vmatpush1.bf16.msra.mxu0 %v1204_v27  ;;  %695 = vmatprep.subr.bf16.mxu1 %v1205_v28 }
  0x52   : > { %748 = vmatprep.subr.bf16.mxu0 %v1207_v29 }
  0x54   : > { %696 = vmatpush1.bf16.msra.mxu1 %v1209_v30 }
  0x55   : > { %749 = vmatpush1.bf16.msra.mxu0 %v1210_v31  ;;  %697 = vmatprep.subr.bf16.mxu1 %v1211_v32 }
  0x56   : > { %750 = vmatprep.subr.bf16.mxu0 %v1213_v33 }
  0x58   : > { %698 = vmatpush1.bf16.msra.mxu1 %v1215_v34 }
  0x59   : > { %751 = vmatpush1.bf16.msra.mxu0 %v1216_v35  ;;  %699 = vmatprep.subr.bf16.mxu1 %v1217_v36 }
  0x5a   : > { %752 = vmatprep.subr.bf16.mxu0 %v1219_v37 }
  0x5c   : > { %700 = vmatpush1.bf16.msra.mxu1 %v1221_v38 }
  0x5d   : > { %753 = vmatpush1.bf16.msra.mxu0 %v1222_v39  ;;  %701 = vmatprep.subr.bf16.mxu1 %v1223_v40 }
  0x5e   : > { %754 = vmatprep.subr.bf16.mxu0 %v1225_v41 }
  0x60   : > { %702 = vmatpush1.bf16.msra.mxu1 %v1227_v42 }
  0x61   : > { %755 = vmatpush1.bf16.msra.mxu0 %v1228_v43  ;;  %703 = vmatprep.subr.bf16.mxu1 %v1229_v44 }
  0x62   : > { %756 = vmatprep.subr.bf16.mxu0 %v1231_v45 }
  0x64   : > { %704 = vmatpush1.bf16.msra.mxu1 %v1233_v46 }
  0x65   : > { %757 = vmatpush1.bf16.msra.mxu0 %v1234_v47  ;;  %705 = vmatprep.subr.bf16.mxu1 %v1235_v48 }
  0x66   : > { %758 = vmatprep.subr.bf16.mxu0 %v1237_v50 }
  0x68   : > { %706 = vmatpush1.bf16.msra.mxu1 %v1239_v52 }
  0x69   : > { %759 = vmatpush1.bf16.msra.mxu0 %v1240_v53  ;;  %707 = vmatprep.subr.bf16.mxu1 %v1241_v54 }
  0x6a   : > { %760 = vmatprep.subr.bf16.mxu0 %v1243_v55 }
  0x6c   : > { %708 = vmatpush1.bf16.msra.mxu1 %v1245_v56 }
  0x6d   : > { %761 = vmatpush1.bf16.msra.mxu0 %v1246_v57  ;;  %709 = vmatprep.subr.bf16.mxu1 %v1247_v58 }
  0x6e   : > { %762 = vmatprep.subr.bf16.mxu0 %v1249_v59 }
  0x70   : > { %710 = vmatpush1.bf16.msra.mxu1 %v1251_v60 }
  0x71   : > { %763 = vmatpush1.bf16.msra.mxu0 %v1252_v61  ;;  %711 = vmatprep.subr.bf16.mxu1 %v1253_v62 }
  0x72   : > { %764 = vmatprep.subr.bf16.mxu0 %v1255_v63 }
  0x74   : > { %712 = vmatpush1.bf16.msra.mxu1 %v1257_v0 }
  0x75   : > { %765 = vmatpush1.bf16.msra.mxu0 %v1258_v1 }
  0x77   : > { %714 = vmatmul.mubr.bf16.vlgmr.msra.gmra.mrb[0].mxu1 %v1259_v2 }
  0x78   : > { %767 = vmatmul.mubr.bf16.vlgmr.msra.gmra.mrb[0].mxu0 %v1262_v3  ;;  %723 = vmatprep.mubr.bf16.mxu1 %v1265_v4 }
  0x79   : > { %776 = vmatprep.mubr.bf16.mxu0 %v1267_v5 }
  0x7f   : > { %724 = vmatmul.mubr.bf16.gmra.mrb[4].mxu1 %v1269_v6 }
  0x80   : > { %777 = vmatmul.mubr.bf16.gmra.mrb[4].mxu0 %v1270_v7 }
 0x14a   : > { %v715_v8 = vpop.f32.mrb[0].mxu1 }
 0x14b   : > { %v768_v9 = vpop.f32.mrb[0].mxu0  ;;  %v717_v11 = vpop.f32.mrb[1].mxu1 }
 0x14c   : > { %v769_v10 = vadd.f32 %v768_v9, %v715_v8  ;;  %v770_v12 = vpop.f32.mrb[1].mxu0  ;;  %v719_v14 = vpop.f32.mrb[2].mxu1 }
 0x14d   : > { %v771_v13 = vadd.f32 %v770_v12, %v717_v11  ;;  %v772_v15 = vpop.f32.mrb[2].mxu0  ;;  %v721_v17 = vpop.f32.mrb[3].mxu1 }
 0x14e   : > { %v773_v16 = vadd.f32 %v772_v15, %v719_v14  ;;  %v774_v18 = vpop.f32.mrb[3].mxu0 }
 0x14f   : > { %v1092_v19 = vpack.c.bf16 %v771_v13, %v769_v10  ;;  %v775_v20 = vadd.f32 %v774_v18, %v721_v17 }
 0x151   : > { %838 = vst [vmem:[%s212_s5] sm:$0xff] %v1092_v19  ;;  %v1093_v21 = vpack.c.bf16 %v775_v20, %v773_v16 }
 0x152   : > { %v725_v22 = vpop.f32.mrb[4].mxu1 }
 0x153   : > { %839 = vst [vmem:[%s212_s5 + $0x8] sm:$0xff] %v1093_v21  ;;  %v778_v23 = vpop.f32.mrb[4].mxu0  ;;  %v727_v25 = vpop.f32.mrb[5].mxu1 }
 0x154   : > { %v779_v24 = vadd.f32 %v778_v23, %v725_v22  ;;  %v780_v26 = vpop.f32.mrb[5].mxu0  ;;  %v729_v28 = vpop.f32.mrb[6].mxu1 }
 0x155   : > { %v781_v27 = vadd.f32 %v780_v26, %v727_v25  ;;  %v782_v29 = vpop.f32.mrb[6].mxu0  ;;  %v731_v31 = vpop.f32.mrb[7].mxu1  ;;  %848 = sbr.rel (!%p1606_p8) target bundleno = 356 (0x164), region = 44 }
 0x156   : > { %v783_v30 = vadd.f32 %v782_v29, %v729_v28  ;;  %v784_v32 = vpop.f32.mrb[7].mxu0 }
 0x157   : > { %v1094_v33 = vpack.c.bf16 %v781_v27, %v779_v24  ;;  %v785_v34 = vadd.f32 %v784_v32, %v731_v31 }
 0x158   : > { %v888_v36 = vld [vmem:[%s212_s5] sm:$0xff] (%p1606_p8) }
 0x159   : > { %840 = vst [vmem:[%s212_s5 + $0x10] sm:$0xff] %v1094_v33  ;;  %v1095_v35 = vpack.c.bf16 %v785_v34, %v783_v30  ;;  %889 = vst [vmem:[%s854_s28] sm:$0xff] (%p1606_p8), %v888_v36 }
 0x15a   : > { %v890_v37 = vld [vmem:[%s212_s5 + $0x8] sm:$0xff] (%p1606_p8) }
 0x15b   : > { %841 = vst [vmem:[%s212_s5 + $0x18] sm:$0xff] %v1095_v35  ;;  %891 = vst [vmem:[%s854_s28 + $0x20] sm:$0xff] (%p1606_p8), %v890_v37 }
 0x160   : > { %v892_v38 = vld [vmem:[%s212_s5 + $0x10] sm:$0xff] }
 0x161   : > { %893 = vst [vmem:[%s854_s28 + $0x40] sm:$0xff] %v892_v38 }
 0x162   : > { %v894_v39 = vld [vmem:[%s212_s5 + $0x18] sm:$0xff] }
 0x163   : > { %895 = vst [vmem:[%s854_s28 + $0x60] sm:$0xff] %v894_v39 }
 0x164 PF: > { %s15_s14 = sadd.s32 1, %s1351_s14   ;;  %s1607_s9 = smov %s1335_s10 }
 0x165   : > { %p12_p9 = scmp.ge.s32.totalorder %s15_s14, 6   ;;  %s1608_s10 = smov %s1339_s11 }
 0x166   : > { %s1609_s11 = smov %s1420_s21  ;;  %s1610_s12 = smov %s1347_s13 }
 0x167   : > { %s1611_s13 = smov %s1613_s16  ;;  %14 = sbr.rel (!%p12_p9) target bundleno = 4 (0x4), region = 117 }
 0x16e   :  { %911 = vsyncpa [#allocation4], 1 }
 0x16f   :  { %913 = vsyncpa [#allocation4 + $0x1], 1 }

// kernel: rope_gqa_attention.6
= control target key start
LH: loop header
LB: loop body
LE: loop exit
PB: predicated region body
PF: predicated region fallthrough
CT: control target
= control target key end

     0   :  { %s1722_s18 = smov 0   ;;  %s1724_s19 = smov 0   ;;  %s1929_s0 = inlined_call_operand.vmem [shape: bf16[32,1024], index: 0, kind: input, shape index: {}, may-alias: {0,2}]   ;;  %s1930_s1 = inlined_call_operand.vmem [shape: bf16[32,256], index: 1, kind: input, shape index: {}]   ;;  %s1931_s2 = inlined_call_operand.vmem [shape: bf16[32,1024], index: 2, kind: input, shape index: {}, may-alias: {0,2}]   ;;  %s1932_s3 = inlined_call_operand.vmem [shape: f32[16,128], index: 3, kind: input, shape index: {}]   ;;  %s1933_s4 = inlined_call_operand.vmem [shape: f32[16,128], index: 4, kind: input, shape index: {}]   ;;  %s1934_s5 = inlined_call_operand.vmem [shape: bf16[32,512], index: 5, kind: output, shape index: {}]  }
   0x1   :  { %s1726_s20 = smov 0   ;;  %s1728_s21 = smov 0  }
   0x2   :  { %s1730_s22 = smov 0   ;;  %s1732_s23 = smov 0  }
   0x3   :  { %s1734_s24 = smov 0   ;;  %s1736_s25 = smov 0  }
   0x4   :  { %s1738_s26 = smov 0  }
   0x5 LB: > { %s1422_s27 = sadd.s32 4294967295, %s1686_s26   ;;  %s37_s28 = sadd.s32 1, %s1678_s24  ;;  %s1686_s26 = sphi %s1738_s26, %s15_s26   ;;  %s1682_s25 = sphi %s1736_s25, %s1953_s25   ;;  %s1678_s24 = sphi %s1734_s24, %s1952_s24   ;;  %s1674_s23 = sphi %s1732_s23, %s1951_s23   ;;  %s1670_s22 = sphi %s1730_s22, %s1950_s22   ;;  %s1666_s21 = sphi %s1728_s21, %s1949_s21   ;;  %s1662_s20 = sphi %s1726_s20, %s1948_s20   ;;  %s1658_s19 = sphi %s1724_s19, %s1947_s19   ;;  %s1654_s18 = sphi %s1722_s18, %s1946_s18  }
   0x6   : > { %p39_p0 = scmp.ge.s32.totalorder %s37_s28, 2  ;;  %s41_s29 = sadd.s32 1, %s1682_s25 }
   0x7   : > { %s52_s30 = sadd.s32 1, %s1666_s21  ;;  %p59_p1 = scmp.ne.s32.totalorder %s1666_s21, %s1662_s20 }
   0x8   : > { %s1955_s28 = smov (%p39_p0, %s37_s28), 0  ;;  %s1957_s29 = smov (!%p39_p0, %s41_s29), %s1682_s25 }
   0x9   : > { %1937 = sst [smem:[#allocation10_spill]] %s1955_s28  ;;  %s48_s6 = ssub.s32 %s1678_s24, %s1955_s28 }
   0xa   : > { %p60_p2 = scmp.eq.s32.totalorder %s1686_s26, 0  ;;  %p43_p3 = scmp.ge.s32.totalorder %s1957_s29, 2 }
   0xb   : > { %s112_s7 = sadd.s32 6, %s1678_s24  ;;  %s116_s9 = sadd.s32 6, %s1955_s28 }
   0xc   : > { %p1785_p4 = por %p60_p2, %p59_p1  ;;  %s1959_s29 = smov (%p43_p3, %s1957_s29), 0 }
   0xd   : > { %1939 = sst [smem:[#allocation11_spill]] %s1959_s29  ;;  %s118_s10 = ssub.s32 %s112_s7, %s116_s9 }
   0xe   : > { %s122_s11 = sadd.s32 1, %s1658_s19  ;;  %s47_s12 = ssub.s32 %s1682_s25, %s1959_s29 }
   0xf   : > { %p129_p5 = scmp.ne.s32.totalorder %s1658_s19, %s1654_s18  ;;  %s49_s13 = sor.u32 %s48_s6, %s47_s12 }
  0x10   : > { %s119_s14 = sor.u32 %s118_s10, %s47_s12  ;;  %p50_p6 = scmp.eq.s32.totalorder %s49_s13, 0 }
  0x11   : > { %p120_p7 = scmp.eq.s32.totalorder %s119_s14, 0  ;;  %p1799_p8 = por %p129_p5, %p60_p2 }
  0x12   : > { %p215_p9 = scmp.eq.s32.totalorder %s1422_s27, 3  ;;  %p1427_p11 = scmp.ge.s32.totalorder %s1686_s26, 4 }
  0x13   : > { %s1804_s16 = scalar_select %p50_p6, %s1666_s21, %s52_s30  }
  0x14   : > { %s1807_s17 = scalar_select %p120_p7, %s1658_s19, %s122_s11  }
  0x15   : > { %1941 = sst [smem:[#allocation12_spill]] %s1804_s16  ;;  %p1812_p10 = por %p215_p9, %p59_p1 }
  0x16   : > { %255 = sbr.rel (%p1427_p11) target bundleno = 53 (0x35), region = 24 }
  0x1d   : > { %258 = sbr.rel (!%p1785_p4) target bundleno = 38 (0x26), region = 28  ;;  %s260_s6 = sand.u32 (%p1785_p4), 1, %s1666_s21  }
  0x1e   : > { %s1430_s27 = sshll.u32 (%p1785_p4), %s1678_s24, 1  ;;  %s1428_s30 = sshll.u32 (%p1785_p4), %s260_s6, 4 }
  0x1f   : > { %s1466_s9 = sshll.u32 (%p1785_p4), %s1682_s25, 4  ;;  %s262_s29 = scalar_lea.vmem (%p1785_p4), [#allocation6], %s1428_s30 }
  0x20   : > { %s267_s10 = sadd.s32 (%p1785_p4), %s1466_s9, %s1430_s27 }
  0x21   : > { %s1432_s11 = sshll.u32 (%p1785_p4), %s267_s10, 2 }
  0x22   : > { %s269_s14 = scalar_lea.vmem (%p1785_p4), %s1929_s0, %s1432_s11 }
  0x23   : > { %v299_v0 = vld [vmem:[%s269_s14] sm:$0xff] (%p1785_p4) }
  0x24   : > { %v301_v1 = vld [vmem:[%s269_s14 + $0x20] sm:$0xff]  ;;  %300 = vst [vmem:[%s262_s29] sm:$0xff] %v299_v0 }
  0x25   : > { %302 = vst [vmem:[%s262_s29 + $0x8] sm:$0xff] %v301_v1 }
  0x26 PF: > { %308 = sbr.rel (!%p1785_p4) target bundleno = 45 (0x2d), region = 66  ;;  %s310_s6 = sand.u32 (%p1785_p4), 1, %s1666_s21  }
  0x27   : > { %s1467_s28 = sshll.u32 (%p1785_p4), %s1682_s25, 2  ;;  %s1433_s27 = sshll.u32 (%p1785_p4), %s310_s6, 3 }
  0x28   : > { %s318_s9 = sadd.s32 (%p1785_p4), %s1678_s24, %s1467_s28  ;;  %s312_s30 = scalar_lea.vmem (%p1785_p4), [#allocation7], %s1433_s27 }
  0x29   : > { %s1436_s10 = sshll.u32 (%p1785_p4), %s318_s9, 2 }
  0x2a   : > { %s320_s11 = scalar_lea.vmem (%p1785_p4), %s1930_s1, %s1436_s10 }
  0x2b   : > { %v336_v2 = vld [vmem:[%s320_s11] sm:$0xf] (%p1785_p4)  ;;  %v338_v3 = vld [vmem:[%s320_s11 + $0x8] sm:$0xf] (%p1785_p4) }
  0x2c   : > { %337 = vst [vmem:[%s312_s30] sm:$0xf] (%p1785_p4), %v336_v2  ;;  %339 = vst [vmem:[%s312_s30 + $0x4] sm:$0xf] (%p1785_p4), %v338_v3 }
  0x2d PF: > { %366 = sbr.rel (!%p1799_p8) target bundleno = 53 (0x35), region = 107  ;;  %s368_s29 = sand.u32 (%p1799_p8), 1, %s1658_s19  }
  0x2e   : > { %s1438_s8 = sshll.u32 (%p1799_p8), %s1682_s25, 4  ;;  %s1437_s28 = sshll.u32 (%p1799_p8), %s368_s29, 3 }
  0x2f   : > { %s1302_s13 = sadd.s32 (%p1799_p8), %s1678_s24, %s1438_s8  ;;  %s370_s27 = scalar_lea.vmem (%p1799_p8), [#allocation8], %s1437_s28 }
  0x30   : > { %s1439_s14 = sshll.u32 (%p1799_p8), %s1302_s13, 2 }
  0x31   : > { %s1304_s9 = scalar_lea.vmem (%p1799_p8), %s1931_s2, %s1439_s14 }
  0x32   : > { %v1440_v4 = vld [vmem:[%s1304_s9 + $0x18] sm:$0xf] (%p1799_p8) }
  0x33   : > { %v1441_v5 = vld [vmem:[%s1304_s9 + $0x38] sm:$0xf] (%p1799_p8)  ;;  %396 = vst [vmem:[%s370_s27] sm:$0xf] (%p1799_p8), %v1440_v4 }
  0x34   : > { %398 = vst [vmem:[%s370_s27 + $0x4] sm:$0xf] %v1441_v5 }
  0x35 PF: > { %p1442_p12 = scmp.ge.s32.totalorder %s1686_s26, 1  ;;  %p424_p13 = scmp.lt.s32.totalorder %s1686_s26, 5 }
  0x37   : > { %p425_p0 = pnand %p1442_p12, %p424_p13 }
  0x38   : > { %s431_s15 = sand.u32 (!%p425_p0), 1, %s1662_s20   ;;  %s1688_s29 = smov (!%p425_p0), 64   ;;  %v534_v15 = vld [vmem:[%s1932_s3] sm:$0xff] (!%p425_p0)  ;;  %v535_v16 = vld [vmem:[%s1932_s3 + $0x8] sm:$0xff] (!%p425_p0)  ;;  %vm521_vm0 = vcmask (!%p425_p0), 7168   ;;  %v897_v40 = vlaneseq (!%p425_p0)  ;;  %vm964_vm3 = vcmask (!%p425_p0), 130048  }
  0x39   : > { %428 = sbr.rel (%p425_p0) target bundleno = 1010 (0x3f2), region = 148  ;;  %s1844_s10 = sshll.u32 (!%p425_p0), %s431_s15, 4  ;;  %v536_v17 = vld [vmem:[%s1933_s4] sm:$0xff] (!%p425_p0)  ;;  %v537_v18 = vld [vmem:[%s1933_s4 + $0x8] sm:$0xff] (!%p425_p0)  ;;  %v1689_v39 = vmov (!%p425_p0), -2.3819763e+38  }
  0x3a   : > { %s1444_s12 = sshll.u32 (!%p425_p0), %s431_s15, 3  ;;  %s433_s11 = scalar_lea.vmem (!%p425_p0), [#allocation6], %s1844_s10  ;;  %524 = vst.msk [vmem:[#allocation3 + $0x10] sm:$0xff] (!%p425_p0), %vm521_vm0, %v1689_v39  ;;  %522 = vst.msk [vmem:[#allocation3] sm:$0xff] (!%p425_p0), %vm521_vm0, %v1689_v39  ;;  %v898_v41 = vshrl.u32 (!%p425_p0), %v897_v40, 7  ;;  %v951_v45 = vand.u32 (!%p425_p0), 127, %v897_v40 }
  0x3b   : > { %v538_v6 = vld [vmem:[%s433_s11] sm:$0xff] (!%p425_p0)   ;;  %v539_v7 = vld [vmem:[%s433_s11 + $0x8] sm:$0xff] (!%p425_p0)   ;;  %s440_s30 = scalar_lea.vmem (!%p425_p0), [#allocation7], %s1444_s12  ;;  %523 = vst.msk [vmem:[#allocation3 + $0x8] sm:$0xff] (!%p425_p0), %vm521_vm0, %v1689_v39  ;;  %525 = vst.msk [vmem:[#allocation3 + $0x18] sm:$0xff] (!%p425_p0), %vm521_vm0, %v1689_v39  ;;  %v1690_v62 = vmov (!%p425_p0), 0  }
  0x3c   : > { %v540_v8 = vunpack.c.l.bf16 (!%p425_p0), %v538_v6  ;;  %v541_v9 = vunpack.c.l.bf16 (!%p425_p0), %v539_v7  ;;  %v556_v10 = vunpack.c.h.bf16 (!%p425_p0), %v538_v6  ;;  %v557_v11 = vunpack.c.h.bf16 (!%p425_p0), %v539_v7  ;;  %v1590_v12 = vld [vmem:[%s440_s30] sm:$0xff] (!%p425_p0)   ;;  %1588 = vset.pattern.permute.xlu1 (!%p425_p0), %v1690_v62  ;;  %1589 = vset.pattern.permute.xlu0 (!%p425_p0), %v1690_v62  ;;  %s445_s27 = sand.u32 (!%p425_p0), 1, %s1654_s18   ;;  %s488_s18 = scalar_lea.vmem (!%p425_p0), [#allocation9], %s1844_s10 }
  0x3d   : > { %1490 = vmatprep.subr.bf16.mxu0 (!%p425_p0), %v1590_v12  ;;  %v900_v42 = vadd.s32 (!%p425_p0), 16, %v898_v41  ;;  %v899_v43 = vadd.s32 (!%p425_p0), 8, %v898_v41  ;;  %v906_v46 = vand.u32 (!%p425_p0), 15, %v898_v41  ;;  %v901_v47 = vadd.s32 (!%p425_p0), 24, %v898_v41  ;;  %s1445_s15 = sshll.u32 (!%p425_p0), %s445_s27, 3 }
  0x3e   : > { %v1578_v13 = vpack.i.bf16 (!%p425_p0), %v541_v9, %v540_v8  ;;  %1491 = vmatpush3.bf16.xpose.msra.mxu0 (!%p425_p0), %v1590_v12  ;;  %v1583_v14 = vpack.i.bf16 (!%p425_p0), %v557_v11, %v556_v10  ;;  %v542_v22 = vmul.f32 (!%p425_p0), %v540_v8, %v534_v15  ;;  %v543_v23 = vmul.f32 (!%p425_p0), %v541_v9, %v535_v16  ;;  %s447_s12 = scalar_lea.vmem (!%p425_p0), [#allocation8], %s1445_s15 }
  0x3f   : > { %v558_v27 = vmul.f32 (!%p425_p0), %v556_v10, %v534_v15  ;;  %v559_v28 = vmul.f32 (!%p425_p0), %v557_v11, %v535_v16  ;;  %v920_v44 = vand.u32 (!%p425_p0), 15, %v900_v42  ;;  %v913_v48 = vand.u32 (!%p425_p0), 15, %v899_v43  ;;  %v1591_v16 = vld [vmem:[%s447_s12] sm:$0xff] (!%p425_p0)  }
  0x40   : > { %1579 = vrot.lane.b32.xlu0 %v1578_v13, %s1688_s29  ;;  %vm952_vm2 = vcmp.le.s32.totalorder %v951_v45, %v906_v46  ;;  %v927_v52 = vand.u32 15, %v901_v47  ;;  %v1691_v63 = vmov 0.0   ;;  %1496 = vmatprep.subr.bf16.mxu1 %v1591_v16  ;;  %s1461_s11 = sshll.u32 (%p1812_p10), %s1670_s22, 1  ;;  %s1472_s30 = sshll.u32 (%p1812_p10), %s1674_s23, 3 }
  0x41   : > { %vm954_vm1 = vcmp.le.s32.totalorder %v951_v45, %v920_v44  ;;  %vm953_vm4 = vcmp.le.s32.totalorder %v951_v45, %v913_v48  ;;  %526 = vst.msk [vmem:[#allocation4] sm:$0xff] %vm521_vm0, %v1691_v63  ;;  %527 = vst.msk [vmem:[#allocation4 + $0x8] sm:$0xff] %vm521_vm0, %v1691_v63  ;;  %v1871_v0 = vld [vmem:[#allocation3 + $0x10] sm:$0xff]  ;;  %v1873_v1 = vld [vmem:[#allocation3] sm:$0xff]  ;;  %1497 = vmatpush3.bf16.msra.mxu1 %v1591_v16 }
  0x42   : > { %vm955_vm5 = vcmp.le.s32.totalorder %v951_v45, %v927_v52  ;;  %528 = vst.msk [vmem:[#allocation4 + $0x10] sm:$0xff] %vm521_vm0, %v1691_v63  ;;  %529 = vst.msk [vmem:[#allocation4 + $0x18] sm:$0xff] %vm521_vm0, %v1691_v63  ;;  %v961_v7 = vld [vmem:[#allocation3 + $0x8] sm:$0xff]  ;;  %v963_v11 = vld [vmem:[#allocation3 + $0x18] sm:$0xff] }
  0x44   : > { %1584 = vrot.lane.b32.xlu0 %v1583_v14, %s1688_s29  ;;  %s1228_s29 = sadd.s32 (%p1812_p10), %s1472_s30, %s1461_s11 }
  0x45   : > { %s1463_s20 = sshll.u32 (%p1812_p10), %s1228_s29, 2 }
  0x46   : > { %s1230_s10 = scalar_lea.vmem (%p1812_p10), %s1934_s5, %s1463_s20 }
  0x48   : > { %v1025_v47 = vld [vmem:[#allocation4] sm:$0xff] }
  0xb2   : > { %v1580_v19 = vpop.permute.xlu0 %1579 }
  0xb3   : > { %v1582_v20 = vunpack.i.h.bf16 %v1580_v19  ;;  %v1581_v21 = vunpack.i.l.bf16 %v1580_v19 }
  0xb5   : > { %v549_v24 = vmul.f32 %v1582_v20, %v537_v18  ;;  %v548_v25 = vmul.f32 %v1581_v21, %v536_v17 }
  0xb6   : > { %v1585_v26 = vpop.permute.xlu0 %1584 }
  0xb7   : > { %v1587_v29 = vunpack.i.h.bf16 %v1585_v26  ;;  %v1586_v30 = vunpack.i.l.bf16 %v1585_v26  ;;  %v550_v31 = vadd.f32 %v548_v25, %v542_v22  ;;  %v551_v32 = vadd.f32 %v549_v24, %v543_v23 }
  0xb9   : > { %v565_v33 = vmul.f32 %v1587_v29, %v537_v18  ;;  %v564_v34 = vmul.f32 %v1586_v30, %v536_v17  ;;  %v552_v35 = vpack.c.bf16 %v551_v32, %v550_v31 }
  0xbb   : > { %1492 = vmatprep.mubr.bf16.mxu0 %v552_v35  ;;  %v566_v36 = vadd.f32 %v564_v34, %v558_v27  ;;  %v567_v37 = vadd.f32 %v565_v33, %v559_v28 }
  0xbd   : > { %v568_v38 = vpack.c.bf16 %v567_v37, %v566_v36 }
  0xbf   : > { %1493 = vmatmul.mubr.bf16.vlgmr.msra.gmra.mrb[0].mxu0 %v568_v38 }
 0x192   : > { %v1494_v49 = vpop.f32.mrb[0].mxu0 }
 0x193   : > { %v958_v50 = vsel %vm954_vm1, %v1494_v49, -2.3819763e+38  ;;  %v882_v51 = vpop.f32.mrb[1].mxu0 }
 0x194   : > { %v956_v53 = vsel %vm952_vm2, %v882_v51, -2.3819763e+38  ;;  %v1495_v54 = vpop.f32.mrb[2].mxu0  ;;  %v971_v55 = vsel %vm964_vm3, %v958_v50, -inf  ;;  %v1026_v51 = vld [vmem:[#allocation4 + $0x8] sm:$0xff] }
 0x195   : > { %972 = vmax.xlane.f32.xlu0 %v971_v55  ;;  %v885_v56 = vpop.f32.mrb[3].mxu0  ;;  %v965_v57 = vsel %vm964_vm3, %v956_v53, -inf  ;;  %v959_v60 = vsel %vm955_vm5, %v1495_v54, -2.3819763e+38 }
 0x196   : > { %v957_v58 = vsel %vm953_vm4, %v885_v56, -2.3819763e+38  ;;  %966 = vmax.xlane.f32.xlu1 %v965_v57  ;;  %v974_v61 = vsel %vm964_vm3, %v959_v60, -inf  ;;  %v1028_v57 = vld [vmem:[#allocation4 + $0x18] sm:$0xff] }
 0x197   : > { %v968_v59 = vsel %vm964_vm3, %v957_v58, -inf }
 0x19a   : > { %969 = vmax.xlane.f32.xlu1 %v968_v59 }
 0x19e   : > { %975 = vmax.xlane.f32.xlu1 %v974_v61 }
 0x222   : > { %v973_v2 = vpop.xlane.xlu0 %972 }
 0x223   : > { %v979_v3 = vmax.f32 %v1871_v0, %v973_v2  ;;  %v967_v4 = vpop.xlane.xlu1 %966 }
 0x224   : > { %v977_v5 = vmax.f32 %v1873_v1, %v967_v4 }
 0x225   : > { %v983_v6 = vsub.f32 %v1871_v0, %v979_v3  ;;  %1155 = vst.msk [vmem:[#allocation3 + $0x10] sm:$0xff] %vm521_vm0, %v979_v3  ;;  %1005 = vperm.xlu1 %1588, %v979_v3  }
 0x226   : > { %v981_v8 = vsub.f32 %v1873_v1, %v977_v5  ;;  %1153 = vst.msk [vmem:[#allocation3] sm:$0xff] %vm521_vm0, %v977_v5 }
 0x227   : > { %v970_v9 = vpop.xlane.xlu1 %969  ;;  %v989_v40 = vmul.f32 1.442695, %v983_v6 }
 0x228   : > { %v978_v10 = vmax.f32 %v961_v7, %v970_v9  ;;  %v985_v41 = vmul.f32 1.442695, %v981_v8 }
 0x229   : > { %995 = vperm.xlu1 %1588, %v977_v5  }
 0x22a   : > { %v982_v12 = vsub.f32 %v961_v7, %v978_v10  ;;  %1154 = vst.msk [vmem:[#allocation3 + $0x8] sm:$0xff] %vm521_vm0, %v978_v10 }
 0x22b   : > { %v976_v13 = vpop.xlane.xlu1 %975 }
 0x22c   : > { %v980_v14 = vmax.f32 %v963_v11, %v976_v13  ;;  %v987_v37 = vmul.f32 1.442695, %v982_v12 }
 0x22d   : > { %1000 = vperm.xlu1 %1588, %v978_v10  }
 0x22e   : > { %v984_v15 = vsub.f32 %v963_v11, %v980_v14  ;;  %1156 = vst.msk [vmem:[#allocation3 + $0x18] sm:$0xff] %vm521_vm0, %v980_v14 }
 0x230   : > { %v991_v42 = vmul.f32 1.442695, %v984_v15 }
 0x231   : > { %1010 = vperm.xlu1 %1588, %v980_v14  }
 0x2a4   : > { %v1006_v17 = vpop.permute.xlu1 %1005 }
 0x2a5   : > { %v1015_v18 = vsub.f32 %v958_v50, %v1006_v17  ;;  %v1027_v50 = vld [vmem:[#allocation4 + $0x10] sm:$0xff] }
 0x2a7   : > { %v1021_v21 = vmul.f32 1.442695, %v1015_v18 }
 0x2a8   : > { %v996_v19 = vpop.permute.xlu1 %995 }
 0x2a9   : > { %v1013_v20 = vsub.f32 %v956_v53, %v996_v19 }
 0x2ab   : > { %v1017_v22 = vmul.f32 1.442695, %v1013_v20 }
 0x2ac   : > { %v1001_v23 = vpop.permute.xlu1 %1000 }
 0x2ad   : > { %1592 = vpow2.f32 %v1017_v22  ;;  %v1014_v24 = vsub.f32 %v957_v58, %v1001_v23 }
 0x2ae   : > { %1594 = vpow2.f32 %v1021_v21 }
 0x2af   : > { %v1019_v25 = vmul.f32 1.442695, %v1014_v24 }
 0x2b0   : > { %v1011_v26 = vpop.permute.xlu1 %1010 }
 0x2b1   : > { %1596 = vpow2.f32 %v1019_v25  ;;  %v1016_v27 = vsub.f32 %v959_v60, %v1011_v26 }
 0x2b3   : > { %v1023_v28 = vmul.f32 1.442695, %v1016_v27 }
 0x2b5   : > { %1598 = vpow2.f32 %v1023_v28 }
 0x2b6   : > { %1600 = vpow2.f32 %v987_v37 }
 0x2b7   : > { %v1593_v29 = vpop.eup %1592  ;;  %1602 = vpow2.f32 %v989_v40 }
 0x2b8   : > { %v1033_v30 = vsel %vm964_vm3, %v1593_v29, 0.0  ;;  %v1595_v31 = vpop.eup %1594  ;;  %1604 = vpow2.f32 %v985_v41 }
 0x2b9   : > { %1034 = vadd.xlane.f32.xlu0 %v1033_v30  ;;  %v1039_v33 = vsel %vm964_vm3, %v1595_v31, 0.0  ;;  %1606 = vpow2.f32 %v991_v42 }
 0x2bb   : > { %v1597_v32 = vpop.eup %1596 }
 0x2bc   : > { %v1036_v34 = vsel %vm964_vm3, %v1597_v32, 0.0  ;;  %v1082_v35 = vpack.c.bf16 %v1597_v32, %v1593_v29 }
 0x2bd   : > { %1040 = vadd.xlane.f32.xlu0 %v1039_v33  ;;  %1037 = vadd.xlane.f32.xlu1 %v1036_v34 }
 0x2be   : > { %1498 = vmatprep.mubr.msk.bf16.mxu1 %vm964_vm3, %v1082_v35 }
 0x2bf   : > { %v1599_v36 = vpop.eup %1598 }
 0x2c0   : > { %v1042_v38 = vsel %vm964_vm3, %v1599_v36, 0.0  ;;  %v1083_v39 = vpack.c.bf16 %v1599_v36, %v1595_v31  ;;  %v1601_v43 = vpop.eup %1600 }
 0x2c1   : > { %1043 = vadd.xlane.f32.xlu0 %v1042_v38  ;;  %v1603_v44 = vpop.eup %1602  ;;  %v1030_v54 = vmul.f32 %v1601_v43, %v1026_v51 }
 0x2c2   : > { %1499 = vmatmul.mubr.msk.bf16.vlgmr.msra.gmra.mrb[0].mxu1 %vm964_vm3, %v1083_v39  ;;  %v1605_v45 = vpop.eup %1604  ;;  %v1031_v53 = vmul.f32 %v1603_v44, %v1027_v50 }
 0x2c3   : > { %v1607_v46 = vpop.eup %1606  ;;  %v1029_v48 = vmul.f32 %v1605_v45, %v1025_v47 }
 0x2c4   : > { %v1032_v60 = vmul.f32 %v1607_v46, %v1028_v57 }
 0x2ce   : > { %1065 = vperm.xlu1 %1588, %v1601_v43  }
 0x2d2   : > { %1070 = vperm.xlu1 %1588, %v1603_v44  }
 0x2d7   : > { %1060 = vperm.xlu0 %1589, %v1605_v45  }
 0x2db   : > { %1075 = vperm.xlu0 %1589, %v1607_v46  }
 0x346   : > { %v1035_v49 = vpop.xlane.xlu0 %1034 }
 0x347   : > { %v1045_v52 = vadd.f32 %v1035_v49, %v1029_v48 }
 0x349   : > { %1050 = vst.msk [vmem:[#allocation4] sm:$0xff] %vm521_vm0, %v1045_v52 }
 0x34a   : > { %v1041_v55 = vpop.xlane.xlu0 %1040  ;;  %v1038_v56 = vpop.xlane.xlu1 %1037 }
 0x34b   : > { %v1047_v58 = vadd.f32 %v1041_v55, %v1031_v53  ;;  %v1046_v59 = vadd.f32 %v1038_v56, %v1030_v54 }
 0x34d   : > { %1052 = vst.msk [vmem:[#allocation4 + $0x10] sm:$0xff] %vm521_vm0, %v1047_v58  ;;  %1051 = vst.msk [vmem:[#allocation4 + $0x8] sm:$0xff] %vm521_vm0, %v1046_v59 }
 0x34e   : > { %v1044_v61 = vpop.xlane.xlu0 %1043  ;;  %v1066_v11 = vpop.permute.xlu1 %1065 }
 0x34f   : > { %v1048_v62 = vadd.f32 %v1044_v61, %v1032_v60  ;;  %v1079_v24 = vmul.f32 0.0, %v1066_v11 }
 0x350   : > { %v1161_v63 = vld [vmem:[#allocation4] sm:$0xff] }
 0x351   : > { %1053 = vst.msk [vmem:[#allocation4 + $0x18] sm:$0xff] %vm521_vm0, %v1048_v62  ;;  %1608 = vrcp.f32 %v1161_v63 }
 0x352   : > { %v1071_v13 = vpop.permute.xlu1 %1070 }
 0x353   : > { %v1080_v15 = vmul.f32 0.0, %v1071_v13 }
 0x354   : > { %v1163_v0 = vld [vmem:[#allocation4 + $0x10] sm:$0xff]  ;;  %v1162_v1 = vld [vmem:[#allocation4 + $0x8] sm:$0xff] }
 0x355   : > { %1610 = vrcp.f32 %v1163_v0 }
 0x356   : > { %1612 = vrcp.f32 %v1162_v1  ;;  %v1061_v12 = vpop.permute.xlu0 %1060 }
 0x357   : > { %v1078_v16 = vmul.f32 0.0, %v1061_v12 }
 0x358   : > { %v1164_v2 = vld [vmem:[#allocation4 + $0x18] sm:$0xff] }
 0x359   : > { %1614 = vrcp.f32 %v1164_v2 }
 0x35a   : > { %v1076_v17 = vpop.permute.xlu0 %1075 }
 0x35b   : > { %v1609_v3 = vpop.eup %1608  ;;  %v1081_v25 = vmul.f32 0.0, %v1076_v17 }
 0x35c   : > { %1175 = vperm.xlu1 %1588, %v1609_v3  }
 0x35f   : > { %v1611_v4 = vpop.eup %1610 }
 0x360   : > { %v1613_v5 = vpop.eup %1612  ;;  %1185 = vperm.xlu1 %1588, %v1611_v4  }
 0x361   : > { %1180 = vperm.xlu0 %1589, %v1613_v5  }
 0x363   : > { %v1615_v6 = vpop.eup %1614 }
 0x365   : > { %1190 = vperm.xlu0 %1589, %v1615_v6  }
 0x395   : > { %v1500_v7 = vpop.f32.mrb[0].mxu1 }
 0x396   : > { %v1130_v8 = vpop.f32.mrb[1].mxu1  ;;  %v1147_v18 = vadd.f32 %v1500_v7, %v1080_v15 }
 0x397   : > { %v1501_v9 = vpop.f32.mrb[2].mxu1  ;;  %v1145_v19 = vadd.f32 %v1130_v8, %v1078_v16 }
 0x398   : > { %v1133_v10 = vpop.f32.mrb[3].mxu1  ;;  %v1148_v27 = vadd.f32 %v1501_v9, %v1081_v25 }
 0x399   : > { %v1146_v28 = vadd.f32 %v1133_v10, %v1079_v24 }
 0x3db   : > { %v1176_v14 = vpop.permute.xlu1 %1175 }
 0x3dc   : > { %v1193_v21 = vmul.f32 %v1176_v14, %v1145_v19 }
 0x3df   : > { %v1186_v20 = vpop.permute.xlu1 %1185 }
 0x3e0   : > { %v1181_v22 = vpop.permute.xlu0 %1180  ;;  %v1195_v23 = vmul.f32 %v1186_v20, %v1147_v18 }
 0x3e1   : > { %v1194_v30 = vmul.f32 %v1181_v22, %v1146_v28 }
 0x3e2   : > { %v1476_v26 = vpack.c.bf16 %v1195_v23, %v1193_v21 }
 0x3e3   : > { %1223 = sbr.rel (!%p1812_p10) target bundleno = 1010 (0x3f2), region = 176 }
 0x3e4   : > { %1477 = vst [vmem:[%s488_s18] sm:$0xff] %v1476_v26   ;;  %v1191_v29 = vpop.permute.xlu0 %1190 }
 0x3e5   : > { %v1196_v31 = vmul.f32 %v1191_v29, %v1148_v27 }
 0x3e7   : > { %v1481_v32 = vpack.c.bf16 %v1196_v31, %v1194_v30 }
 0x3e9   : > { %1483 = vst [vmem:[%s488_s18 + $0x8] sm:$0xff] %v1481_v32  }
 0x3eb   : > { %v1260_v33 = vld [vmem:[%s488_s18] sm:$0xff] }
 0x3ec   : > { %1261 = vst [vmem:[%s1230_s10] sm:$0xff] %v1260_v33 }
 0x3f0   : > { %v1262_v34 = vld [vmem:[%s488_s18 + $0x8] sm:$0xff] }
 0x3f1   : > { %1263 = vst [vmem:[%s1230_s10 + $0x10] sm:$0xff] %v1262_v34 }
 0x3f2 PF: > { %s15_s26 = sadd.s32 1, %s1686_s26   ;;  %s1943_s22 = sld [smem:[#allocation12_spill]] }
 0x3f3   : > { %p12_p1 = scmp.ge.s32.totalorder %s15_s26, 6   ;;  %s1944_s7 = sld [smem:[#allocation10_spill]] }
 0x3f4   : > { %s1945_s13 = sld [smem:[#allocation11_spill]]  ;;  %s1946_s18 = smov %s1658_s19 }
 0x3f5   : > { %s1947_s19 = smov %s1807_s17  ;;  %s1948_s20 = smov %s1666_s21 }
 0x3f6   : > { %s1951_s23 = smov %s1682_s25  ;;  %14 = sbr.rel (!%p12_p1) target bundleno = 5 (0x5), region = 267 }
 0x3f8   : > { %s1949_s21 = smov %s1943_s22  ;;  %s1950_s22 = smov %s1678_s24 }
 0x3f9   : > { %s1952_s24 = smov %s1944_s7 }
 0x3fa   : > { %s1953_s25 = smov %s1945_s13 }

// kernel: rope_gqa_attention.7
= control target key start
LH: loop header
LB: loop body
LE: loop exit
PB: predicated region body
PF: predicated region fallthrough
CT: control target
= control target key end

     0   :  { %7 = vsyncpa [#allocation5], 0  ;;  %s1925_s0 = inlined_call_operand.vmem [shape: bf16[32,512], index: 0, kind: input, shape index: {}]   ;;  %s1926_s1 = inlined_call_operand.vmem [shape: bf16[512,512], index: 1, kind: input, shape index: {}]   ;;  %s1927_s2 = inlined_call_operand.hbm [shape: f32[32,512], index: 2, kind: output, shape index: {}]  }
   0x1   :  { %9 = vsyncpa [#allocation5 + $0x1], 0  ;;  %s1579_s9 = smov 0   ;;  %s1581_s10 = smov 0  }
   0x2   :  { %s1583_s11 = smov 0   ;;  %s1585_s12 = smov 0  }
   0x3   :  { %s1587_s13 = smov 0   ;;  %s1589_s14 = smov 0  }
   0x4 LB: > { %s1216_s15 = sadd.s32 4294967295, %s1558_s14   ;;  %s1217_s16 = sadd.s32 4294967294, %s1558_s14   ;;  %s1558_s14 = sphi %s1589_s14, %s15_s14   ;;  %s1554_s13 = sphi %s1587_s13, %s1934_s13   ;;  %s1550_s12 = sphi %s1585_s12, %s1933_s12   ;;  %s1546_s11 = sphi %s1583_s11, %s1932_s11   ;;  %s1542_s10 = sphi %s1581_s10, %s1931_s10   ;;  %s1538_s9 = sphi %s1579_s9, %s1930_s9  }
   0x5   : > { %s30_s17 = sadd.s32 1, %s1554_s13  ;;  %s71_s18 = sadd.s32 1, %s1546_s11 }
   0x6   : > { %p32_p0 = scmp.ge.s32.totalorder %s30_s17, 2  ;;  %p78_p1 = scmp.ne.s32.totalorder %s1546_s11, %s1542_s10 }
   0x7   : > { %p79_p2 = scmp.eq.s32.totalorder %s1558_s14, 0  ;;  %p110_p3 = scmp.eq.s32.totalorder %s1216_s15, 1 }
   0x8   : > { %s1936_s17 = smov (%p32_p0, %s30_s17), 0  ;;  %p115_p6 = scmp.ne.s32.totalorder %s1542_s10, %s1538_s9 }
   0x9   : > { %p80_p4 = por %p79_p2, %p78_p1  ;;  %p1618_p5 = por %p110_p3, %p78_p1 }
   0xa   : > { %s67_s20 = ssub.s32 %s1554_s13, %s1936_s17  ;;  %p116_p8 = scmp.eq.s32.totalorder %s1217_s16, 1 }
   0xb   : > { %p69_p7 = scmp.eq.s32.totalorder %s67_s20, 0  ;;  %p1220_p10 = scmp.ge.s32.totalorder %s1558_s14, 2 }
   0xc   : > { %p1629_p9 = por %p116_p8, %p115_p6 }
   0xd   : > { %s1627_s21 = scalar_select %p69_p7, %s1546_s11, %s71_s18  }
   0xe   : > { %147 = sbr.rel (%p1220_p10) target bundleno = 57 (0x39), region = 20 }
  0x15   : > { %150 = sbr.rel (!%p80_p4) target bundleno = 57 (0x39), region = 24  ;;  %s152_s23 = sand.u32 (%p80_p4), 1, %s1546_s11  }
  0x16   : > { %s1304_s24 = sshll.u32 (%p80_p4), %s1554_s13, 3  ;;  %s1221_s25 = sshll.u32 (%p80_p4), %s152_s23, 9 }
  0x17   : > { %s1641_s28 = scalar_lea.vmem (%p80_p4), %s1926_s1, %s1304_s24  ;;  %s1646_s29 = scalar_lea.vmem (%p80_p4), [#allocation3], %s1221_s25 }
  0x18   : > { %v314_v0 = vld [vmem:[%s1641_s28] sm:$0xff] (%p80_p4)  ;;  %v316_v1 = vld [vmem:[%s1641_s28 + $0x10] sm:$0xff] (%p80_p4) }
  0x19   : > { %v318_v2 = vld [vmem:[%s1641_s28 + $0x20] sm:$0xff] (%p80_p4)  ;;  %315 = vst [vmem:[%s1646_s29] sm:$0xff] (%p80_p4), %v314_v0  ;;  %317 = vst [vmem:[%s1646_s29 + $0x8] sm:$0xff] (%p80_p4), %v316_v1  ;;  %v320_v3 = vld [vmem:[%s1641_s28 + $0x30] sm:$0xff] (%p80_p4) }
  0x1a   : > { %319 = vst [vmem:[%s1646_s29 + $0x10] sm:$0xff] (%p80_p4), %v318_v2  ;;  %v322_v4 = vld [vmem:[%s1641_s28 + $0x40] sm:$0xff] (%p80_p4)  ;;  %v324_v5 = vld [vmem:[%s1641_s28 + $0x50] sm:$0xff] (%p80_p4)  ;;  %321 = vst [vmem:[%s1646_s29 + $0x18] sm:$0xff] (%p80_p4), %v320_v3 }
  0x1b   : > { %323 = vst [vmem:[%s1646_s29 + $0x20] sm:$0xff] (%p80_p4), %v322_v4  ;;  %325 = vst [vmem:[%s1646_s29 + $0x28] sm:$0xff] (%p80_p4), %v324_v5  ;;  %v326_v6 = vld [vmem:[%s1641_s28 + $0x60] sm:$0xff] (%p80_p4)  ;;  %v328_v7 = vld [vmem:[%s1641_s28 + $0x70] sm:$0xff] (%p80_p4) }
  0x1c   : > { %v330_v8 = vld [vmem:[%s1641_s28 + $0x80] sm:$0xff]  ;;  %327 = vst [vmem:[%s1646_s29 + $0x30] sm:$0xff] %v326_v6  ;;  %329 = vst [vmem:[%s1646_s29 + $0x38] sm:$0xff] %v328_v7  ;;  %v332_v9 = vld [vmem:[%s1641_s28 + $0x90] sm:$0xff] }
  0x1d   : > { %331 = vst [vmem:[%s1646_s29 + $0x40] sm:$0xff] %v330_v8  ;;  %v334_v10 = vld [vmem:[%s1641_s28 + $0xa0] sm:$0xff]  ;;  %v336_v11 = vld [vmem:[%s1641_s28 + $0xb0] sm:$0xff]  ;;  %333 = vst [vmem:[%s1646_s29 + $0x48] sm:$0xff] %v332_v9 }
  0x1e   : > { %335 = vst [vmem:[%s1646_s29 + $0x50] sm:$0xff] %v334_v10  ;;  %337 = vst [vmem:[%s1646_s29 + $0x58] sm:$0xff] %v336_v11  ;;  %v338_v12 = vld [vmem:[%s1641_s28 + $0xc0] sm:$0xff]  ;;  %v340_v13 = vld [vmem:[%s1641_s28 + $0xd0] sm:$0xff] }
  0x1f   : > { %v342_v14 = vld [vmem:[%s1641_s28 + $0xe0] sm:$0xff]  ;;  %339 = vst [vmem:[%s1646_s29 + $0x60] sm:$0xff] %v338_v12  ;;  %341 = vst [vmem:[%s1646_s29 + $0x68] sm:$0xff] %v340_v13  ;;  %v344_v15 = vld [vmem:[%s1641_s28 + $0xf0] sm:$0xff] }
  0x20   : > { %343 = vst [vmem:[%s1646_s29 + $0x70] sm:$0xff] %v342_v14  ;;  %v346_v16 = vld [vmem:[%s1641_s28 + $0x100] sm:$0xff]  ;;  %v348_v17 = vld [vmem:[%s1641_s28 + $0x110] sm:$0xff]  ;;  %345 = vst [vmem:[%s1646_s29 + $0x78] sm:$0xff] %v344_v15 }
  0x21   : > { %347 = vst [vmem:[%s1646_s29 + $0x80] sm:$0xff] %v346_v16  ;;  %349 = vst [vmem:[%s1646_s29 + $0x88] sm:$0xff] %v348_v17  ;;  %v350_v18 = vld [vmem:[%s1641_s28 + $0x120] sm:$0xff]  ;;  %v352_v19 = vld [vmem:[%s1641_s28 + $0x130] sm:$0xff] }
  0x22   : > { %v354_v20 = vld [vmem:[%s1641_s28 + $0x140] sm:$0xff]  ;;  %351 = vst [vmem:[%s1646_s29 + $0x90] sm:$0xff] %v350_v18  ;;  %353 = vst [vmem:[%s1646_s29 + $0x98] sm:$0xff] %v352_v19  ;;  %v356_v21 = vld [vmem:[%s1641_s28 + $0x150] sm:$0xff] }
  0x23   : > { %355 = vst [vmem:[%s1646_s29 + $0xa0] sm:$0xff] %v354_v20  ;;  %v358_v22 = vld [vmem:[%s1641_s28 + $0x160] sm:$0xff]  ;;  %v360_v23 = vld [vmem:[%s1641_s28 + $0x170] sm:$0xff]  ;;  %357 = vst [vmem:[%s1646_s29 + $0xa8] sm:$0xff] %v356_v21 }
  0x24   : > { %359 = vst [vmem:[%s1646_s29 + $0xb0] sm:$0xff] %v358_v22  ;;  %361 = vst [vmem:[%s1646_s29 + $0xb8] sm:$0xff] %v360_v23  ;;  %v362_v24 = vld [vmem:[%s1641_s28 + $0x180] sm:$0xff]  ;;  %v364_v25 = vld [vmem:[%s1641_s28 + $0x190] sm:$0xff] }
  0x25   : > { %v366_v26 = vld [vmem:[%s1641_s28 + $0x1a0] sm:$0xff]  ;;  %363 = vst [vmem:[%s1646_s29 + $0xc0] sm:$0xff] %v362_v24  ;;  %365 = vst [vmem:[%s1646_s29 + $0xc8] sm:$0xff] %v364_v25  ;;  %v368_v27 = vld [vmem:[%s1641_s28 + $0x1b0] sm:$0xff] }
  0x26   : > { %367 = vst [vmem:[%s1646_s29 + $0xd0] sm:$0xff] %v366_v26  ;;  %v370_v28 = vld [vmem:[%s1641_s28 + $0x1c0] sm:$0xff]  ;;  %v372_v29 = vld [vmem:[%s1641_s28 + $0x1d0] sm:$0xff]  ;;  %369 = vst [vmem:[%s1646_s29 + $0xd8] sm:$0xff] %v368_v27 }
  0x27   : > { %371 = vst [vmem:[%s1646_s29 + $0xe0] sm:$0xff] %v370_v28  ;;  %373 = vst [vmem:[%s1646_s29 + $0xe8] sm:$0xff] %v372_v29  ;;  %v374_v30 = vld [vmem:[%s1641_s28 + $0x1e0] sm:$0xff]  ;;  %v376_v31 = vld [vmem:[%s1641_s28 + $0x1f0] sm:$0xff] }
  0x28   : > { %v378_v32 = vld [vmem:[%s1641_s28 + $0x200] sm:$0xff]  ;;  %375 = vst [vmem:[%s1646_s29 + $0xf0] sm:$0xff] %v374_v30  ;;  %377 = vst [vmem:[%s1646_s29 + $0xf8] sm:$0xff] %v376_v31  ;;  %v380_v33 = vld [vmem:[%s1641_s28 + $0x210] sm:$0xff] }
  0x29   : > { %379 = vst [vmem:[%s1646_s29 + $0x100] sm:$0xff] %v378_v32  ;;  %v382_v34 = vld [vmem:[%s1641_s28 + $0x220] sm:$0xff]  ;;  %v384_v35 = vld [vmem:[%s1641_s28 + $0x230] sm:$0xff]  ;;  %381 = vst [vmem:[%s1646_s29 + $0x108] sm:$0xff] %v380_v33 }
  0x2a   : > { %383 = vst [vmem:[%s1646_s29 + $0x110] sm:$0xff] %v382_v34  ;;  %385 = vst [vmem:[%s1646_s29 + $0x118] sm:$0xff] %v384_v35  ;;  %v386_v36 = vld [vmem:[%s1641_s28 + $0x240] sm:$0xff]  ;;  %v388_v37 = vld [vmem:[%s1641_s28 + $0x250] sm:$0xff] }
  0x2b   : > { %v390_v38 = vld [vmem:[%s1641_s28 + $0x260] sm:$0xff]  ;;  %387 = vst [vmem:[%s1646_s29 + $0x120] sm:$0xff] %v386_v36  ;;  %389 = vst [vmem:[%s1646_s29 + $0x128] sm:$0xff] %v388_v37  ;;  %v392_v39 = vld [vmem:[%s1641_s28 + $0x270] sm:$0xff] }
  0x2c   : > { %391 = vst [vmem:[%s1646_s29 + $0x130] sm:$0xff] %v390_v38  ;;  %v394_v40 = vld [vmem:[%s1641_s28 + $0x280] sm:$0xff]  ;;  %v396_v41 = vld [vmem:[%s1641_s28 + $0x290] sm:$0xff]  ;;  %393 = vst [vmem:[%s1646_s29 + $0x138] sm:$0xff] %v392_v39 }
  0x2d   : > { %395 = vst [vmem:[%s1646_s29 + $0x140] sm:$0xff] %v394_v40  ;;  %397 = vst [vmem:[%s1646_s29 + $0x148] sm:$0xff] %v396_v41  ;;  %v398_v42 = vld [vmem:[%s1641_s28 + $0x2a0] sm:$0xff]  ;;  %v400_v43 = vld [vmem:[%s1641_s28 + $0x2b0] sm:$0xff] }
  0x2e   : > { %v402_v44 = vld [vmem:[%s1641_s28 + $0x2c0] sm:$0xff]  ;;  %399 = vst [vmem:[%s1646_s29 + $0x150] sm:$0xff] %v398_v42  ;;  %401 = vst [vmem:[%s1646_s29 + $0x158] sm:$0xff] %v400_v43  ;;  %v404_v45 = vld [vmem:[%s1641_s28 + $0x2d0] sm:$0xff] }
  0x2f   : > { %403 = vst [vmem:[%s1646_s29 + $0x160] sm:$0xff] %v402_v44  ;;  %v406_v46 = vld [vmem:[%s1641_s28 + $0x2e0] sm:$0xff]  ;;  %v408_v47 = vld [vmem:[%s1641_s28 + $0x2f0] sm:$0xff]  ;;  %405 = vst [vmem:[%s1646_s29 + $0x168] sm:$0xff] %v404_v45 }
  0x30   : > { %407 = vst [vmem:[%s1646_s29 + $0x170] sm:$0xff] %v406_v46  ;;  %409 = vst [vmem:[%s1646_s29 + $0x178] sm:$0xff] %v408_v47  ;;  %v410_v48 = vld [vmem:[%s1641_s28 + $0x300] sm:$0xff]  ;;  %v412_v49 = vld [vmem:[%s1641_s28 + $0x310] sm:$0xff] }
  0x31   : > { %v414_v50 = vld [vmem:[%s1641_s28 + $0x320] sm:$0xff]  ;;  %411 = vst [vmem:[%s1646_s29 + $0x180] sm:$0xff] %v410_v48  ;;  %413 = vst [vmem:[%s1646_s29 + $0x188] sm:$0xff] %v412_v49  ;;  %v416_v51 = vld [vmem:[%s1641_s28 + $0x330] sm:$0xff] }
  0x32   : > { %415 = vst [vmem:[%s1646_s29 + $0x190] sm:$0xff] %v414_v50  ;;  %v418_v52 = vld [vmem:[%s1641_s28 + $0x340] sm:$0xff]  ;;  %v420_v53 = vld [vmem:[%s1641_s28 + $0x350] sm:$0xff]  ;;  %417 = vst [vmem:[%s1646_s29 + $0x198] sm:$0xff] %v416_v51 }
  0x33   : > { %419 = vst [vmem:[%s1646_s29 + $0x1a0] sm:$0xff] %v418_v52  ;;  %421 = vst [vmem:[%s1646_s29 + $0x1a8] sm:$0xff] %v420_v53  ;;  %v422_v54 = vld [vmem:[%s1641_s28 + $0x360] sm:$0xff]  ;;  %v424_v55 = vld [vmem:[%s1641_s28 + $0x370] sm:$0xff] }
  0x34   : > { %v426_v56 = vld [vmem:[%s1641_s28 + $0x380] sm:$0xff]  ;;  %423 = vst [vmem:[%s1646_s29 + $0x1b0] sm:$0xff] %v422_v54  ;;  %425 = vst [vmem:[%s1646_s29 + $0x1b8] sm:$0xff] %v424_v55  ;;  %v428_v57 = vld [vmem:[%s1641_s28 + $0x390] sm:$0xff] }
  0x35   : > { %427 = vst [vmem:[%s1646_s29 + $0x1c0] sm:$0xff] %v426_v56  ;;  %v430_v58 = vld [vmem:[%s1641_s28 + $0x3a0] sm:$0xff]  ;;  %v432_v59 = vld [vmem:[%s1641_s28 + $0x3b0] sm:$0xff]  ;;  %429 = vst [vmem:[%s1646_s29 + $0x1c8] sm:$0xff] %v428_v57 }
  0x36   : > { %431 = vst [vmem:[%s1646_s29 + $0x1d0] sm:$0xff] %v430_v58  ;;  %433 = vst [vmem:[%s1646_s29 + $0x1d8] sm:$0xff] %v432_v59  ;;  %v434_v60 = vld [vmem:[%s1641_s28 + $0x3c0] sm:$0xff]  ;;  %v436_v61 = vld [vmem:[%s1641_s28 + $0x3d0] sm:$0xff] }
  0x37   : > { %v438_v62 = vld [vmem:[%s1641_s28 + $0x3e0] sm:$0xff]  ;;  %435 = vst [vmem:[%s1646_s29 + $0x1e0] sm:$0xff] %v434_v60  ;;  %437 = vst [vmem:[%s1646_s29 + $0x1e8] sm:$0xff] %v436_v61  ;;  %v440_v63 = vld [vmem:[%s1641_s28 + $0x3f0] sm:$0xff] }
  0x38   : > { %439 = vst [vmem:[%s1646_s29 + $0x1f0] sm:$0xff] %v438_v62  ;;  %441 = vst [vmem:[%s1646_s29 + $0x1f8] sm:$0xff] %v440_v63 }
  0x39 PF: > { %p1224_p11 = scmp.ge.s32.totalorder %s1558_s14, 1  ;;  %p446_p12 = scmp.lt.s32.totalorder %s1558_s14, 3 }
  0x3b   : > { %p447_p13 = pnand %p1224_p11, %p446_p12 }
  0x3c   : > { %s1776_s30 = sand.u32 (!%p447_p13), 1, %s1542_s10   ;;  %v1470_v0 = vld [vmem:[%s1925_s0 + $0x4] ss:$16 sps:$4 sm:$0xff] (!%p447_p13)   ;;  %v1473_v1 = vld [vmem:[%s1925_s0 + $0xc] ss:$16 sps:$4 sm:$0xff] (!%p447_p13)   ;;  %s1305_s7 = sshll.u32 (!%p447_p13), %s1550_s12, 8 }
  0x3d   : > { %450 = sbr.rel (%p447_p13) target bundleno = 370 (0x172), region = 62  ;;  %s1225_s3 = sshll.u32 (!%p447_p13), %s1776_s30, 9  ;;  %984 = vmatprep.mubr.bf16.mxu1 (!%p447_p13), %v1470_v0  ;;  %1037 = vmatprep.mubr.bf16.mxu0 (!%p447_p13), %v1473_v1 }
  0x3e   : > { %s1785_s8 = scalar_lea.vmem (!%p447_p13), [#allocation3], %s1225_s3  ;;  %s1226_s4 = sshll.u32 (!%p447_p13), %s1776_s30, 6 }
  0x3f   : > { %v1372_v2 = vld [vmem:[%s1785_s8 + $0x4] ss:$8 sps:$4 sm:$0xff] (!%p447_p13)   ;;  %v1376_v4 = vld [vmem:[%s1785_s8] ss:$8 sps:$4 sm:$0xff] (!%p447_p13)   ;;  %v1378_v6 = vld [vmem:[%s1785_s8 + $0x14] ss:$8 sps:$4 sm:$0xff] (!%p447_p13)   ;;  %s1876_s12 = scalar_lea.hbm (!%p447_p13), %s1927_s2, %s1305_s7 }
  0x40   : > { %v1374_v3 = vld [vmem:[%s1785_s8 + $0x104] ss:$8 sps:$4 sm:$0xff] (!%p447_p13)   ;;  %952 = vmatprep.subr.bf16.mxu1 (!%p447_p13), %v1372_v2  ;;  %v1377_v5 = vld [vmem:[%s1785_s8 + $0x100] ss:$8 sps:$4 sm:$0xff] (!%p447_p13)   ;;  %v1380_v7 = vld [vmem:[%s1785_s8 + $0x114] ss:$8 sps:$4 sm:$0xff] (!%p447_p13)  }
  0x41   : > { %1005 = vmatprep.subr.bf16.mxu0 (!%p447_p13), %v1374_v3  ;;  %953 = vmatpush1.bf16.msra.mxu1 (!%p447_p13), %v1376_v4  ;;  %v1382_v8 = vld [vmem:[%s1785_s8 + $0x10] ss:$8 sps:$4 sm:$0xff] (!%p447_p13)   ;;  %v1384_v10 = vld [vmem:[%s1785_s8 + $0x24] ss:$8 sps:$4 sm:$0xff] (!%p447_p13)   ;;  %v1388_v12 = vld [vmem:[%s1785_s8 + $0x20] ss:$8 sps:$4 sm:$0xff] (!%p447_p13)  }
  0x42   : > { %1006 = vmatpush1.bf16.msra.mxu0 (!%p447_p13), %v1377_v5  ;;  %954 = vmatprep.subr.bf16.mxu1 (!%p447_p13), %v1378_v6  ;;  %v1383_v9 = vld [vmem:[%s1785_s8 + $0x110] ss:$8 sps:$4 sm:$0xff] (!%p447_p13)   ;;  %v1386_v11 = vld [vmem:[%s1785_s8 + $0x124] ss:$8 sps:$4 sm:$0xff] (!%p447_p13)   ;;  %v1389_v13 = vld [vmem:[%s1785_s8 + $0x120] ss:$8 sps:$4 sm:$0xff] (!%p447_p13)  }
  0x43   : > { %1007 = vmatprep.subr.bf16.mxu0 (!%p447_p13), %v1380_v7  ;;  %v1390_v14 = vld [vmem:[%s1785_s8 + $0x34] ss:$8 sps:$4 sm:$0xff] (!%p447_p13)   ;;  %v1394_v16 = vld [vmem:[%s1785_s8 + $0x30] ss:$8 sps:$4 sm:$0xff] (!%p447_p13)   ;;  %v1396_v18 = vld [vmem:[%s1785_s8 + $0x44] ss:$8 sps:$4 sm:$0xff] (!%p447_p13)  }
  0x44   : > { %v1392_v15 = vld [vmem:[%s1785_s8 + $0x134] ss:$8 sps:$4 sm:$0xff]   ;;  %v1395_v17 = vld [vmem:[%s1785_s8 + $0x130] ss:$8 sps:$4 sm:$0xff]   ;;  %v1398_v19 = vld [vmem:[%s1785_s8 + $0x144] ss:$8 sps:$4 sm:$0xff]  }
  0x45   : > { %955 = vmatpush1.bf16.msra.mxu1 %v1382_v8  ;;  %v1400_v20 = vld [vmem:[%s1785_s8 + $0x40] ss:$8 sps:$4 sm:$0xff]   ;;  %v1402_v22 = vld [vmem:[%s1785_s8 + $0x54] ss:$8 sps:$4 sm:$0xff]   ;;  %v1406_v24 = vld [vmem:[%s1785_s8 + $0x50] ss:$8 sps:$4 sm:$0xff]  }
  0x46   : > { %1008 = vmatpush1.bf16.msra.mxu0 %v1383_v9  ;;  %956 = vmatprep.subr.bf16.mxu1 %v1384_v10  ;;  %v1401_v21 = vld [vmem:[%s1785_s8 + $0x140] ss:$8 sps:$4 sm:$0xff]   ;;  %v1404_v23 = vld [vmem:[%s1785_s8 + $0x154] ss:$8 sps:$4 sm:$0xff]   ;;  %v1407_v25 = vld [vmem:[%s1785_s8 + $0x150] ss:$8 sps:$4 sm:$0xff]  }
  0x47   : > { %1009 = vmatprep.subr.bf16.mxu0 %v1386_v11  ;;  %v1408_v26 = vld [vmem:[%s1785_s8 + $0x64] ss:$8 sps:$4 sm:$0xff]   ;;  %v1412_v28 = vld [vmem:[%s1785_s8 + $0x60] ss:$8 sps:$4 sm:$0xff]   ;;  %v1414_v30 = vld [vmem:[%s1785_s8 + $0x74] ss:$8 sps:$4 sm:$0xff]  }
  0x48   : > { %v1410_v27 = vld [vmem:[%s1785_s8 + $0x164] ss:$8 sps:$4 sm:$0xff]   ;;  %v1413_v29 = vld [vmem:[%s1785_s8 + $0x160] ss:$8 sps:$4 sm:$0xff]   ;;  %v1416_v31 = vld [vmem:[%s1785_s8 + $0x174] ss:$8 sps:$4 sm:$0xff]  }
  0x49   : > { %957 = vmatpush1.bf16.msra.mxu1 %v1388_v12  ;;  %v1418_v32 = vld [vmem:[%s1785_s8 + $0x70] ss:$8 sps:$4 sm:$0xff]   ;;  %v1420_v34 = vld [vmem:[%s1785_s8 + $0x84] ss:$8 sps:$4 sm:$0xff]   ;;  %v1424_v36 = vld [vmem:[%s1785_s8 + $0x80] ss:$8 sps:$4 sm:$0xff]  }
  0x4a   : > { %1010 = vmatpush1.bf16.msra.mxu0 %v1389_v13  ;;  %958 = vmatprep.subr.bf16.mxu1 %v1390_v14  ;;  %v1419_v33 = vld [vmem:[%s1785_s8 + $0x170] ss:$8 sps:$4 sm:$0xff]   ;;  %v1422_v35 = vld [vmem:[%s1785_s8 + $0x184] ss:$8 sps:$4 sm:$0xff]   ;;  %v1425_v37 = vld [vmem:[%s1785_s8 + $0x180] ss:$8 sps:$4 sm:$0xff]  }
  0x4b   : > { %1011 = vmatprep.subr.bf16.mxu0 %v1392_v15  ;;  %v1426_v38 = vld [vmem:[%s1785_s8 + $0x94] ss:$8 sps:$4 sm:$0xff]   ;;  %v1430_v40 = vld [vmem:[%s1785_s8 + $0x90] ss:$8 sps:$4 sm:$0xff]   ;;  %v1432_v42 = vld [vmem:[%s1785_s8 + $0xa4] ss:$8 sps:$4 sm:$0xff]  }
  0x4c   : > { %v1428_v39 = vld [vmem:[%s1785_s8 + $0x194] ss:$8 sps:$4 sm:$0xff]   ;;  %v1431_v41 = vld [vmem:[%s1785_s8 + $0x190] ss:$8 sps:$4 sm:$0xff]   ;;  %v1434_v43 = vld [vmem:[%s1785_s8 + $0x1a4] ss:$8 sps:$4 sm:$0xff]  }
  0x4d   : > { %959 = vmatpush1.bf16.msra.mxu1 %v1394_v16  ;;  %v1436_v44 = vld [vmem:[%s1785_s8 + $0xa0] ss:$8 sps:$4 sm:$0xff]   ;;  %v1438_v46 = vld [vmem:[%s1785_s8 + $0xb4] ss:$8 sps:$4 sm:$0xff]   ;;  %v1442_v48 = vld [vmem:[%s1785_s8 + $0xb0] ss:$8 sps:$4 sm:$0xff]  }
  0x4e   : > { %1012 = vmatpush1.bf16.msra.mxu0 %v1395_v17  ;;  %960 = vmatprep.subr.bf16.mxu1 %v1396_v18  ;;  %v1437_v45 = vld [vmem:[%s1785_s8 + $0x1a0] ss:$8 sps:$4 sm:$0xff]   ;;  %v1440_v47 = vld [vmem:[%s1785_s8 + $0x1b4] ss:$8 sps:$4 sm:$0xff]   ;;  %v1443_v49 = vld [vmem:[%s1785_s8 + $0x1b0] ss:$8 sps:$4 sm:$0xff]  }
  0x4f   : > { %1013 = vmatprep.subr.bf16.mxu0 %v1398_v19  ;;  %v1444_v50 = vld [vmem:[%s1785_s8 + $0xc4] ss:$8 sps:$4 sm:$0xff]   ;;  %v1448_v52 = vld [vmem:[%s1785_s8 + $0xc0] ss:$8 sps:$4 sm:$0xff]   ;;  %v1450_v54 = vld [vmem:[%s1785_s8 + $0xd4] ss:$8 sps:$4 sm:$0xff]  }
  0x50   : > { %v1446_v51 = vld [vmem:[%s1785_s8 + $0x1c4] ss:$8 sps:$4 sm:$0xff]   ;;  %v1449_v53 = vld [vmem:[%s1785_s8 + $0x1c0] ss:$8 sps:$4 sm:$0xff]   ;;  %v1452_v55 = vld [vmem:[%s1785_s8 + $0x1d4] ss:$8 sps:$4 sm:$0xff]  }
  0x51   : > { %961 = vmatpush1.bf16.msra.mxu1 %v1400_v20  ;;  %v1454_v56 = vld [vmem:[%s1785_s8 + $0xd0] ss:$8 sps:$4 sm:$0xff]   ;;  %v1456_v58 = vld [vmem:[%s1785_s8 + $0xe4] ss:$8 sps:$4 sm:$0xff]   ;;  %v1460_v60 = vld [vmem:[%s1785_s8 + $0xe0] ss:$8 sps:$4 sm:$0xff]  }
  0x52   : > { %1014 = vmatpush1.bf16.msra.mxu0 %v1401_v21  ;;  %962 = vmatprep.subr.bf16.mxu1 %v1402_v22  ;;  %v1455_v57 = vld [vmem:[%s1785_s8 + $0x1d0] ss:$8 sps:$4 sm:$0xff]   ;;  %v1458_v59 = vld [vmem:[%s1785_s8 + $0x1e4] ss:$8 sps:$4 sm:$0xff]   ;;  %v1461_v61 = vld [vmem:[%s1785_s8 + $0x1e0] ss:$8 sps:$4 sm:$0xff]  }
  0x53   : > { %1015 = vmatprep.subr.bf16.mxu0 %v1404_v23  ;;  %v1462_v62 = vld [vmem:[%s1785_s8 + $0xf4] ss:$8 sps:$4 sm:$0xff]   ;;  %v1466_v0 = vld [vmem:[%s1785_s8 + $0xf0] ss:$8 sps:$4 sm:$0xff]   ;;  %s483_s5 = scalar_lea.vmem [#allocation4], %s1226_s4  ;;  %s1094_s16 = scalar_lea.sflag [#allocation5], %s1776_s30 }
  0x54   : > { %v1464_v63 = vld [vmem:[%s1785_s8 + $0x1f4] ss:$8 sps:$4 sm:$0xff]   ;;  %v1467_v1 = vld [vmem:[%s1785_s8 + $0x1f0] ss:$8 sps:$4 sm:$0xff]   ;;  %s1110_s6 = sshll.u32 %s483_s5, 4  ;;  %s1560_s20 = smov [#allocation4]   ;;  %s1871_s6 = int_to_ptr.vmem [resolvable:$true] %s1110_s6 }
  0x55   : > { %963 = vmatpush1.bf16.msra.mxu1 %v1406_v24  ;;  %v1468_v2 = vld [vmem:[%s1925_s0] ss:$16 sps:$4 sm:$0xff]   ;;  %v1471_v3 = vld [vmem:[%s1925_s0 + $0x8] ss:$16 sps:$4 sm:$0xff]   ;;  %v1474_v4 = vld [vmem:[%s1925_s0 + $0x24] ss:$16 sps:$4 sm:$0xff]  }
  0x56   : > { %1016 = vmatpush1.bf16.msra.mxu0 %v1407_v25  ;;  %964 = vmatprep.subr.bf16.mxu1 %v1408_v26  ;;  %v1476_v5 = vld [vmem:[%s1925_s0 + $0x2c] ss:$16 sps:$4 sm:$0xff]   ;;  %v1478_v6 = vld [vmem:[%s1925_s0 + $0x20] ss:$16 sps:$4 sm:$0xff]   ;;  %v1479_v7 = vld [vmem:[%s1925_s0 + $0x28] ss:$16 sps:$4 sm:$0xff]  }
  0x57   : > { %1017 = vmatprep.subr.bf16.mxu0 %v1410_v27  ;;  %s1480_s18 = scalar_lea.vmem %s1871_s6, 1024  ;;  %s1484_s23 = sshll.u32 %s1560_s20, 4  ;;  %s1485_s23 = int_to_ptr.vmem [resolvable:$false] %s1484_s23 }
  0x58   : > { %p1481_p0 = scmp.ne.s32.totalorder %s1871_s6, %s1480_s18  ;;  %s1486_s24 = scalar_lea.vmem %s1485_s23, 2048 }
  0x59   : > { %965 = vmatpush1.bf16.msra.mxu1 %v1412_v28  ;;  %p1487_p3 = scmp.lt.s32.totalorder %s1871_s6, %s1485_s23  ;;  %p1488_p4 = scmp.lt.s32.totalorder %s1486_s24, %s1480_s18 }
  0x5a   : > { %1018 = vmatpush1.bf16.msra.mxu0 %v1413_v29  ;;  %966 = vmatprep.subr.bf16.mxu1 %v1414_v30  ;;  %p1482_p1 = pnand %p1481_p0, %p1618_p5 }
  0x5b   : > { %1019 = vmatprep.subr.bf16.mxu0 %v1416_v31  ;;  %p1489_p6 = por %p1488_p4, %p1487_p3 }
  0x5c   : > { %p1483_p2 = pneg %p1482_p1 }
  0x5d   : > { %967 = vmatpush1.bf16.msra.mxu1 %v1418_v32 }
  0x5e   : > { %1020 = vmatpush1.bf16.msra.mxu0 %v1419_v33  ;;  %968 = vmatprep.subr.bf16.mxu1 %v1420_v34  ;;  %p1490_p7 = pnand %p1489_p6, %p1483_p2 }
  0x5f   : > { %1021 = vmatprep.subr.bf16.mxu0 %v1422_v35 }
  0x61   : > { %969 = vmatpush1.bf16.msra.mxu1 %v1424_v36 }
  0x62   : > { %1022 = vmatpush1.bf16.msra.mxu0 %v1425_v37  ;;  %970 = vmatprep.subr.bf16.mxu1 %v1426_v38 }
  0x63   : > { %1023 = vmatprep.subr.bf16.mxu0 %v1428_v39 }
  0x65   : > { %971 = vmatpush1.bf16.msra.mxu1 %v1430_v40 }
  0x66   : > { %1024 = vmatpush1.bf16.msra.mxu0 %v1431_v41  ;;  %972 = vmatprep.subr.bf16.mxu1 %v1432_v42 }
  0x67   : > { %1025 = vmatprep.subr.bf16.mxu0 %v1434_v43 }
  0x69   : > { %973 = vmatpush1.bf16.msra.mxu1 %v1436_v44 }
  0x6a   : > { %1026 = vmatpush1.bf16.msra.mxu0 %v1437_v45  ;;  %974 = vmatprep.subr.bf16.mxu1 %v1438_v46 }
  0x6b   : > { %1027 = vmatprep.subr.bf16.mxu0 %v1440_v47 }
  0x6d   : > { %975 = vmatpush1.bf16.msra.mxu1 %v1442_v48 }
  0x6e   : > { %1028 = vmatpush1.bf16.msra.mxu0 %v1443_v49  ;;  %976 = vmatprep.subr.bf16.mxu1 %v1444_v50 }
  0x6f   : > { %1029 = vmatprep.subr.bf16.mxu0 %v1446_v51 }
  0x71   : > { %977 = vmatpush1.bf16.msra.mxu1 %v1448_v52 }
  0x72   : > { %1030 = vmatpush1.bf16.msra.mxu0 %v1449_v53  ;;  %978 = vmatprep.subr.bf16.mxu1 %v1450_v54 }
  0x73   : > { %1031 = vmatprep.subr.bf16.mxu0 %v1452_v55 }
  0x75   : > { %979 = vmatpush1.bf16.msra.mxu1 %v1454_v56 }
  0x76   : > { %1032 = vmatpush1.bf16.msra.mxu0 %v1455_v57  ;;  %980 = vmatprep.subr.bf16.mxu1 %v1456_v58 }
  0x77   : > { %1033 = vmatprep.subr.bf16.mxu0 %v1458_v59 }
  0x79   : > { %981 = vmatpush1.bf16.msra.mxu1 %v1460_v60 }
  0x7a   : > { %1034 = vmatpush1.bf16.msra.mxu0 %v1461_v61  ;;  %982 = vmatprep.subr.bf16.mxu1 %v1462_v62 }
  0x7b   : > { %1035 = vmatprep.subr.bf16.mxu0 %v1464_v63 }
  0x7d   : > { %983 = vmatpush1.bf16.msra.mxu1 %v1466_v0 }
  0x7e   : > { %1036 = vmatpush1.bf16.msra.mxu0 %v1467_v1 }
  0x80   : > { %985 = vmatmul.mubr.bf16.vlgmr.msra.gmra.mrb[0].mxu1 %v1468_v2 }
  0x81   : > { %1038 = vmatmul.mubr.bf16.vlgmr.msra.gmra.mrb[0].mxu0 %v1471_v3  ;;  %994 = vmatprep.mubr.bf16.mxu1 %v1474_v4 }
  0x82   : > { %1047 = vmatprep.mubr.bf16.mxu0 %v1476_v5 }
  0x88   : > { %995 = vmatmul.mubr.bf16.gmra.mrb[4].mxu1 %v1478_v6 }
  0x89   : > { %1048 = vmatmul.mubr.bf16.gmra.mrb[4].mxu0 %v1479_v7 }
 0x153   : > { %v986_v8 = vpop.f32.mrb[0].mxu1 }
 0x154   : > { %v1039_v9 = vpop.f32.mrb[0].mxu0  ;;  %v988_v11 = vpop.f32.mrb[1].mxu1 }
 0x155   : > { %v1040_v10 = vadd.f32 %v1039_v9, %v986_v8  ;;  %v1041_v12 = vpop.f32.mrb[1].mxu0  ;;  %v990_v14 = vpop.f32.mrb[2].mxu1 }
 0x156   : > { %v1042_v13 = vadd.f32 %v1041_v12, %v988_v11  ;;  %v1043_v15 = vpop.f32.mrb[2].mxu0  ;;  %v992_v17 = vpop.f32.mrb[3].mxu1 }
 0x157   : > { %1085 = vst [vmem:[%s483_s5] sm:$0xff] %v1040_v10  ;;  %v1044_v16 = vadd.f32 %v1043_v15, %v990_v14  ;;  %v1045_v18 = vpop.f32.mrb[3].mxu0 }
 0x158   : > { %1086 = vst [vmem:[%s483_s5 + $0x8] sm:$0xff] %v1042_v13  ;;  %v1046_v19 = vadd.f32 %v1045_v18, %v992_v17 }
 0x159   : > { %1087 = vst [vmem:[%s483_s5 + $0x10] sm:$0xff] %v1044_v16 }
 0x15a   : > { %1088 = vst [vmem:[%s483_s5 + $0x18] sm:$0xff] %v1046_v19 }
 0x15b   : > { %v996_v20 = vpop.f32.mrb[4].mxu1 }
 0x15c   : > { %v1049_v21 = vpop.f32.mrb[4].mxu0  ;;  %v998_v23 = vpop.f32.mrb[5].mxu1 }
 0x15d   : > { %v1050_v22 = vadd.f32 %v1049_v21, %v996_v20  ;;  %v1051_v24 = vpop.f32.mrb[5].mxu0  ;;  %v1000_v26 = vpop.f32.mrb[6].mxu1 }
 0x15e   : > { %v1052_v25 = vadd.f32 %v1051_v24, %v998_v23  ;;  %v1053_v27 = vpop.f32.mrb[6].mxu0  ;;  %v1002_v29 = vpop.f32.mrb[7].mxu1 }
 0x15f   : > { %1089 = vst [vmem:[%s483_s5 + $0x20] sm:$0xff] %v1050_v22  ;;  %v1054_v28 = vadd.f32 %v1053_v27, %v1000_v26  ;;  %v1055_v30 = vpop.f32.mrb[7].mxu0 }
 0x160   : > { %1090 = vst [vmem:[%s483_s5 + $0x28] sm:$0xff] %v1052_v25  ;;  %v1056_v31 = vadd.f32 %v1055_v30, %v1002_v29 }
 0x161   : > { %1091 = vst [vmem:[%s483_s5 + $0x30] sm:$0xff] %v1054_v28 }
 0x162   : > { %1092 = vst [vmem:[%s483_s5 + $0x38] sm:$0xff] %v1056_v31 }
 0x163   : > { %1493 = shalt.err (!%p1490_p7)
}
 0x164   : > { %s1494_s25 = scalar_lea.hbm %s1876_s12, 1024  ;;  %s1498_s28 = scalar_lea.hbm %s1927_s2, 2048 }
 0x165   : > { %p1495_p8 = scmp.ne.s32.totalorder %s1876_s12, %s1494_s25  ;;  %p1499_p13 = scmp.lt.u32.totalorder %s1876_s12, %s1927_s2 }
 0x166   : > { %p1500_p0 = scmp.lt.u32.totalorder %s1498_s28, %s1494_s25  ;;  %p1502_p2 = scmp.lt.u32.totalorder %s1494_s25, %s1876_s12 }
 0x167   : > { %p1496_p11 = pnand %p1495_p8, %p1618_p5 }
 0x168   : > { %p1501_p1 = por %p1500_p0, %p1499_p13 }
 0x169   : > { %p1497_p12 = pneg %p1496_p11 }
 0x16a   : > { %p1503_p3 = por %p1502_p2, %p1501_p1 }
 0x16c   : > { %p1504_p4 = pnand %p1503_p3, %p1497_p12 }
 0x16e   : > { %1507 = shalt.err (!%p1504_p4)
}
 0x16f   : > { %s1561_s4 = smov 256   ;;  %s1562_s5 = smov 512  }
 0x170   : > { %s1563_s7 = smov 16  }
 0x171   : > { %1314 = dma.vmem_to_hbm [thread:$0]  (%p1618_p5), %s1871_s6, 1024, %s1876_s12, %s1094_s16, %s1561_s4, %s1562_s5, %s1563_s7  }
 0x172 PF: > { %s1125_s8 = sand.u32 1, %s1538_s9   ;;  %p1317_p6 = pnand %p1220_p10, %p1629_p9 }
 0x173   : > { %s1126_s15 = scalar_lea.sflag [#allocation5], %s1125_s8 }
 0x174   : > { %1533 = dma.done.wait (!%p1317_p6), %s1126_s15, 1024  }
 0x175   : > { %1535 = vsyncadd (!%p1317_p6), %s1126_s15, 4294966272  ;;  %s15_s14 = sadd.s32 1, %s1558_s14   ;;  %s1930_s9 = smov %s1542_s10 }
 0x176   : > { %p12_p7 = scmp.ge.s32.totalorder %s15_s14, 4   ;;  %s1931_s10 = smov %s1546_s11 }
 0x177   : > { %s1932_s11 = smov %s1627_s21  ;;  %s1933_s12 = smov %s1554_s13 }
 0x178   : > { %s1934_s13 = smov %s1936_s17  ;;  %14 = sbr.rel (!%p12_p7) target bundleno = 4 (0x4), region = 117 }
 0x17f   :  { %1131 = vsyncpa [#allocation5], 1 }
 0x180   :  { %1133 = vsyncpa [#allocation5 + $0x1], 1 }

</bundles_post_ra>
